<compile_context>
chip_gen: v7x
topology: tpu7x:2x2x1
jax: 0.10.0
libtpu: 0.0.40
codegen_flags: <defaults>
</compile_context>

<pallas_src>
import jax
import jax.numpy as jnp
from jax.experimental import pallas as pl
from jax.experimental.pallas import tpu as pltpu

H = 768        # BERT-base hidden size (fixed by nn.Linear(768, ...))
LANES = 128    # TPU lane width; task logits padded to a multiple of this


def _round_up(x, m):
    return ((x + m - 1) // m) * m


def _head_kernel(task_id_ref, x_ref, w1_ref, b1_ref, w2_ref, b2_ref, o_ref):
    """relu(x @ W1 + b1) @ W2[task] + b2[task] for one batch row tile.

    task_id_ref : SMEM [1] int32  (consumed by the W2/b2 index_maps only)
    x_ref  : [TM, H]       bf16  CLS hidden states (row tile)
    w1_ref : [H, H]        bf16  sharedLinear weight (in, out)
    b1_ref : [1, H]        f32   sharedLinear bias
    w2_ref : [1, H, Lpad]  bf16  task-specific weight (selected task)
    b2_ref : [1, 1, Lpad]  f32   task-specific bias  (selected task)
    o_ref  : [TM, Lpad]    f32   logits (lane-padded)
    """
    del task_id_ref  # used only by the index_maps, not by the body
    h = jnp.dot(x_ref[...], w1_ref[...], preferred_element_type=jnp.float32) + b1_ref[...]
    h = jnp.maximum(h, 0.0)                               # ReLU of nn.Sequential
    logits = jnp.dot(h.astype(jnp.bfloat16), w2_ref[0],
                     preferred_element_type=jnp.float32) + b2_ref[0]
    o_ref[...] = logits


def prepare_multitask_params(w1, b1, task_weights, task_biases, task_order):
    """One-time parameter preparation (cast + pad + stack). NOT on the call path.

    w1: [H, H] (in, out); b1: [H]
    task_weights: dict task -> [H, n_labels]; task_biases: dict task -> [n_labels]
    task_order: list fixing the stacking order / integer task ids.
    """
    l_pad = LANES
    for t in task_order:
        l_pad = max(l_pad, _round_up(task_weights[t].shape[1], LANES))

    n_tasks = len(task_order)
    w2_all = jnp.zeros((n_tasks, H, l_pad), jnp.bfloat16)
    b2_all = jnp.zeros((n_tasks, 1, l_pad), jnp.float32)
    n_labels = {}
    for i, t in enumerate(task_order):
        n = task_weights[t].shape[1]
        n_labels[t] = n
        w2_all = w2_all.at[i, :, :n].set(task_weights[t].astype(jnp.bfloat16))
        b2_all = b2_all.at[i, 0, :n].set(task_biases[t].astype(jnp.float32))

    return {
        "w1": w1.astype(jnp.bfloat16),
        "b1": b1.reshape(1, H).astype(jnp.float32),
        "w2_all": w2_all,
        "b2_all": b2_all,
        "task_index": {t: i for i, t in enumerate(task_order)},
        "n_labels": n_labels,
        "l_pad": l_pad,
    }


def multitask_bert_head(hidden_states, params, task, *, block_b=256):
    """hidden_states: [B, S, H] BERT last_hidden_state.  Returns [B, n_labels[task]]."""
    B = hidden_states.shape[0]
    l_pad = params["l_pad"]
    n_labels = params["n_labels"][task]
    task_id = jnp.array([params["task_index"][task]], dtype=jnp.int32)

    # CLS token (step 2 of the module's forward); fed to the kernel in bf16 so
    # the row-tile DMA is half-width and the MXU LHS needs no in-kernel cast.
    x_cls = hidden_states[:, 0, :].astype(jnp.bfloat16)          # [B, H]

    # Row tile: multiple of 16 (bf16 sublane pack); guard user-passed block_b.
    block_b = max(16, _round_up(block_b, 16))
    tm = min(block_b, _round_up(B, 16))
    b_pad = _round_up(B, tm)
    # Tiny grids: collapse to one step so resident weights are fetched once
    # (avoids each v7x TensorCore DMAing its own W1 copy for a 2-step grid).
    if b_pad // tm < 4 and b_pad <= 1024:
        tm = b_pad
    num_steps = b_pad // tm
    semantics = ("parallel",) if num_steps >= 4 else ("arbitrary",)

    if b_pad != B:
        x_cls = jnp.pad(x_cls, ((0, b_pad - B), (0, 0)))

    # Advisory cost for XLA's scheduler around this small custom call.
    bytes_accessed = (
        b_pad * H * 2                 # x (bf16)
        + H * H * 2                   # W1 (bf16)
        + H * 4                       # b1 (f32)
        + H * l_pad * 2               # W2[task] (bf16)
        + l_pad * 4                   # b2[task] (f32)
        + b_pad * l_pad * 4           # output (f32)
    )
    cost = pl.CostEstimate(
        flops=2 * b_pad * H * (H + l_pad),
        transcendentals=0,
        bytes_accessed=bytes_accessed,
    )

    out = pl.pallas_call(
        _head_kernel,
        out_shape=jax.ShapeDtypeStruct((b_pad, l_pad), jnp.float32),
        grid_spec=pltpu.PrefetchScalarGridSpec(
            num_scalar_prefetch=1,
            grid=(num_steps,),
            in_specs=[
                pl.BlockSpec((tm, H), lambda i, tid: (i, 0)),            # x row tile
                pl.BlockSpec((H, H), lambda i, tid: (0, 0),              # W1 (resident)
                             pipeline_mode=pl.Buffered(1)),
                pl.BlockSpec((1, H), lambda i, tid: (0, 0),              # b1
                             pipeline_mode=pl.Buffered(1)),
                pl.BlockSpec((1, H, l_pad), lambda i, tid: (tid[0], 0, 0),  # W2[task]
                             pipeline_mode=pl.Buffered(1)),
                pl.BlockSpec((1, 1, l_pad), lambda i, tid: (tid[0], 0, 0),  # b2[task]
                             pipeline_mode=pl.Buffered(1)),
            ],
            out_specs=pl.BlockSpec((tm, l_pad), lambda i, tid: (i, 0)),
        ),
        compiler_params=pltpu.CompilerParams(
            dimension_semantics=semantics,
        ),
        cost_estimate=cost,
    )(task_id, x_cls, params["w1"], params["b1"], params["w2_all"], params["b2_all"])

    return out[:B, :n_labels]


if __name__ == "__main__":
    # Small shapes consistent with the module: hidden=768 fixed by nn.Linear(768, .),
    # batch=16, seq=8; two tasks as in the multi-task setting.
    B, S = 16, 8
    tasks = {"nli": 3, "sentiment": 2}
    task_order = list(tasks.keys())
    task = "nli"

    key = jax.random.PRNGKey(0)
    k_x, k_w1, k_b1, *k_tasks = jax.random.split(key, 3 + 2 * len(task_order))

    # Simulated BERT last_hidden_state (the encoder itself is not reproduced).
    hidden_states = jax.random.normal(k_x, (B, S, H), dtype=jnp.float32)

    # Parameters (shapes from the module's __init__), stored as [in, out].
    w1 = jax.random.normal(k_w1, (H, H), dtype=jnp.float32) * 0.02
    b1 = jax.random.normal(k_b1, (H,), dtype=jnp.float32) * 0.02
    task_weights, task_biases = {}, {}
    for i, t in enumerate(task_order):
        kw, kb = k_tasks[2 * i], k_tasks[2 * i + 1]
        task_weights[t] = jax.random.normal(kw, (H, tasks[t]), dtype=jnp.float32) * 0.02
        task_biases[t] = jax.random.normal(kb, (tasks[t],), dtype=jnp.float32) * 0.02

    # One-time prep: bf16 cast, lane-pad labels, stack all task heads.
    params = prepare_multitask_params(w1, b1, task_weights, task_biases, task_order)

    logits = multitask_bert_head(hidden_states, params, task)
    logits = jax.block_until_ready(logits)
    assert logits.shape == (B, tasks[task]), logits.shape

    # Reference matching the kernel's numerics (bf16 MXU inputs, f32 accumulate).
    ti = params["task_index"][task]
    x = hidden_states[:, 0, :].astype(jnp.bfloat16).astype(jnp.float32)
    w1_b = params["w1"].astype(jnp.float32)
    h_ref = jnp.maximum(x @ w1_b + params["b1"], 0.0)
    w2_b = params["w2_all"][ti, :, : tasks[task]].astype(jnp.float32)
    b2_r = params["b2_all"][ti, 0, : tasks[task]]
    ref_bf16 = h_ref.astype(jnp.bfloat16).astype(jnp.float32) @ w2_b + b2_r
    assert jnp.allclose(logits, ref_bf16, atol=1e-3, rtol=1e-3), "mismatch vs bf16-matched reference"

    # Loose sanity check against the pure-f32 reference (bf16 rounding only).
    ref_f32 = (jnp.maximum(hidden_states[:, 0, :] @ w1 + b1, 0.0)
               @ task_weights[task] + task_biases[task])
    assert jnp.allclose(logits, ref_f32, atol=5e-2, rtol=5e-2), "mismatch vs f32 reference"

    print("KERNEL_OK")
</pallas_src>

<mosaic_0001>
module attributes {stable_mosaic.version = 11 : i64} {
  func.func @_head_kernel(%arg0: i32, %arg1: memref<1xi32, #tpu.memory_space<smem>>, %arg2: memref<16x768xbf16, #tpu.memory_space<vmem>>, %arg3: memref<768x768xbf16, #tpu.memory_space<vmem>>, %arg4: memref<1x768xf32, #tpu.memory_space<vmem>>, %arg5: memref<1x768x128xbf16, #tpu.memory_space<vmem>>, %arg6: memref<1x1x128xf32, #tpu.memory_space<vmem>>, %arg7: memref<16x128xf32, #tpu.memory_space<vmem>>) attributes {dimension_semantics = [#tpu.dimension_semantics<arbitrary>], iteration_bounds = array<i64: 1>, scalar_prefetch = 1 : i64, scratch_operands = 0 : i64, tpu.core_type = #tpu.core_type<tc>, window_params = [{transform_indices = @transform_0, window_bounds = array<i64: 16, 768>}, {pipeline_mode = #tpu.pipeline_mode<synchronous>, transform_indices = @transform_1, window_bounds = array<i64: 768, 768>}, {pipeline_mode = #tpu.pipeline_mode<synchronous>, transform_indices = @transform_2, window_bounds = array<i64: 1, 768>}, {pipeline_mode = #tpu.pipeline_mode<synchronous>, transform_indices = @transform_3, window_bounds = array<i64: 1, 768, 128>}, {pipeline_mode = #tpu.pipeline_mode<synchronous>, transform_indices = @transform_4, window_bounds = array<i64: 1, 1, 128>}, {transform_indices = @transform_5, window_bounds = array<i64: 16, 128>}]} {
    %c0 = arith.constant 0 : index
    %c0_0 = arith.constant 0 : index
    %0 = vector.load %arg2[%c0, %c0_0] : memref<16x768xbf16, #tpu.memory_space<vmem>>, vector<16x768xbf16>
    %c0_1 = arith.constant 0 : index
    %c0_2 = arith.constant 0 : index
    %1 = vector.load %arg3[%c0_1, %c0_2] : memref<768x768xbf16, #tpu.memory_space<vmem>>, vector<768x768xbf16>
    %cst = arith.constant dense<0.000000e+00> : vector<16x768xf32>
    %2 = tpu.matmul %0, %1, %cst {dimension_numbers = #tpu.dot_dimension_numbers<[1], [0], [0], [1], [0, 0, 1, 1], [], []>} : vector<16x768xbf16>, vector<768x768xbf16>, vector<16x768xf32> -> vector<16x768xf32>
    %c0_3 = arith.constant 0 : index
    %c0_4 = arith.constant 0 : index
    %3 = vector.load %arg4[%c0_3, %c0_4] : memref<1x768xf32, #tpu.memory_space<vmem>>, vector<1x768xf32>
    %4 = vector.broadcast %3 : vector<1x768xf32> to vector<16x768xf32>
    %5 = arith.addf %2, %4 : vector<16x768xf32>
    %cst_5 = arith.constant 0.000000e+00 : f32
    %6 = vector.broadcast %cst_5 : f32 to vector<16x768xf32>
    %7 = arith.maximumf %5, %6 : vector<16x768xf32>
    %8 = arith.truncf %7 : vector<16x768xf32> to vector<16x768xbf16>
    %c0_6 = arith.constant 0 : index
    %c0_7 = arith.constant 0 : index
    %c0_8 = arith.constant 0 : index
    %9 = vector.load %arg5[%c0_6, %c0_7, %c0_8] : memref<1x768x128xbf16, #tpu.memory_space<vmem>>, vector<1x768x128xbf16>
    %10 = vector.shape_cast %9 : vector<1x768x128xbf16> to vector<768x128xbf16>
    %cst_9 = arith.constant dense<0.000000e+00> : vector<16x128xf32>
    %11 = tpu.matmul %8, %10, %cst_9 {dimension_numbers = #tpu.dot_dimension_numbers<[1], [0], [0], [1], [0, 0, 1, 1], [], []>} : vector<16x768xbf16>, vector<768x128xbf16>, vector<16x128xf32> -> vector<16x128xf32>
    %c0_10 = arith.constant 0 : index
    %c0_11 = arith.constant 0 : index
    %c0_12 = arith.constant 0 : index
    %12 = vector.load %arg6[%c0_10, %c0_11, %c0_12] : memref<1x1x128xf32, #tpu.memory_space<vmem>>, vector<1x1x128xf32>
    %13 = vector.shape_cast %12 : vector<1x1x128xf32> to vector<1x128xf32>
    %14 = vector.broadcast %13 : vector<1x128xf32> to vector<16x128xf32>
    %15 = arith.addf %11, %14 : vector<16x128xf32>
    %c0_13 = arith.constant 0 : index
    %c0_14 = arith.constant 0 : index
    %16 = vector.load %arg7[%c0_13, %c0_14] : memref<16x128xf32, #tpu.memory_space<vmem>>, vector<16x128xf32>
    tpu.vector_store %arg7[%c0_13, %c0_14], %15 {strides = array<i32>} : memref<16x128xf32, #tpu.memory_space<vmem>>, vector<16x128xf32>,
    return
  }
  func.func @transform_0(%arg0: i32, %arg1: memref<1xi32, #tpu.memory_space<smem>>) -> (i32, i32) {
    %c0_i32 = arith.constant 0 : i32
    %c0_i32_0 = arith.constant 0 : i32
    return %arg0, %c0_i32 : i32, i32
  }
  func.func @transform_1(%arg0: i32, %arg1: memref<1xi32, #tpu.memory_space<smem>>) -> (i32, i32) {
    %c0_i32 = arith.constant 0 : i32
    %c0_i32_0 = arith.constant 0 : i32
    %c0_i32_1 = arith.constant 0 : i32
    return %c0_i32, %c0_i32_0 : i32, i32
  }
  func.func @transform_2(%arg0: i32, %arg1: memref<1xi32, #tpu.memory_space<smem>>) -> (i32, i32) {
    %c0_i32 = arith.constant 0 : i32
    %c0_i32_0 = arith.constant 0 : i32
    %c0_i32_1 = arith.constant 0 : i32
    return %c0_i32, %c0_i32_0 : i32, i32
  }
  func.func @transform_3(%arg0: i32, %arg1: memref<1xi32, #tpu.memory_space<smem>>) -> (i32, i32, i32) {
    %c0 = arith.constant 0 : index
    %0 = memref.load %arg1[%c0] : memref<1xi32, #tpu.memory_space<smem>>
    %c0_i32 = arith.constant 0 : i32
    %c0_i32_0 = arith.constant 0 : i32
    %c0_i32_1 = arith.constant 0 : i32
    return %0, %c0_i32, %c0_i32_0 : i32, i32, i32
  }
  func.func @transform_4(%arg0: i32, %arg1: memref<1xi32, #tpu.memory_space<smem>>) -> (i32, i32, i32) {
    %c0 = arith.constant 0 : index
    %0 = memref.load %arg1[%c0] : memref<1xi32, #tpu.memory_space<smem>>
    %c0_i32 = arith.constant 0 : i32
    %c0_i32_0 = arith.constant 0 : i32
    %c0_i32_1 = arith.constant 0 : i32
    return %0, %c0_i32, %c0_i32_0 : i32, i32, i32
  }
  func.func @transform_5(%arg0: i32, %arg1: memref<1xi32, #tpu.memory_space<smem>>) -> (i32, i32) {
    %c0_i32 = arith.constant 0 : i32
    %c0_i32_0 = arith.constant 0 : i32
    return %arg0, %c0_i32 : i32, i32
  }
}

</mosaic_0001>

<bundles_post_ra>
// kernel: tpu_custom_call.1
= control target key start
LH: loop header
LB: loop body
LE: loop exit
PB: predicated region body
PF: predicated region fallthrough
CT: control target
= control target key end

     0   :  { %12 = vsyncpa [#allocation5], 0  ;;  %s4114_s0 = inlined_call_operand.<no memory space> [shape: s32[1], index: 0, kind: input, shape index: {}]   ;;  %s4115_s1 = inlined_call_operand.hbm [shape: bf16[16,768], index: 1, kind: input, shape index: {}]   ;;  %s4116_s2 = inlined_call_operand.hbm [shape: bf16[768,768], index: 2, kind: input, shape index: {}]   ;;  %s4117_s3 = inlined_call_operand.hbm [shape: f32[1,768], index: 3, kind: input, shape index: {}]   ;;  %s4118_s4 = inlined_call_operand.hbm [shape: bf16[2,768,128], index: 4, kind: input, shape index: {}]   ;;  %s4119_s5 = inlined_call_operand.hbm [shape: f32[2,1,128], index: 5, kind: input, shape index: {}]   ;;  %s4120_s6 = inlined_call_operand.hbm [shape: f32[16,128], index: 6, kind: output, shape index: {}]  }
   0x1   :  { %13 = vsyncpa [#allocation8], 0 }
   0x2   :  { %14 = vsyncpa [#allocation11], 0 }
   0x3   :  { %15 = vsyncpa [#allocation6], 0  ;;  %s3284_s23 = smul.u32 6144, %s4114_s0  ;;  %s3934_s24 = smov [#allocation7]  }
   0x4   :  { %s33_s25 = sshll.u32 %s3934_s24, 4  ;;  %s3790_s7 = scalar_lea.hbm %s4116_s2, 36864  ;;  %s34_s25 = int_to_ptr.vmem [resolvable:$true] %s33_s25 }
   0x5   :  { %s3987_s28 = scalar_lea.hbm %s4118_s4, %s3284_s23  ;;  %p3791_p0 = scmp.ne.s32.totalorder %s4116_s2, %s3790_s7 }
   0x6   :  { %p3794_p1 = scmp.lt.u32.totalorder %s3790_s7, %s4116_s2 }
   0x8   :  { %p3796_p2 = pnand %p3794_p1, %p3791_p0 }
   0xa   :  { %3799 = shalt.err (!%p3796_p2)
}
   0xb   :  { %s3800_s12 = scalar_lea.vmem %s34_s25, 36864  ;;  %p3805_p4 = scmp.lt.s32.totalorder %s34_s25, %s34_s25 }
   0xc   :  { %p3801_p3 = scmp.ne.s32.totalorder %s34_s25, %s3800_s12  ;;  %p3806_p5 = scmp.lt.s32.totalorder %s3800_s12, %s3800_s12 }
   0xe   :  { %p3807_p6 = por %p3806_p5, %p3805_p4 }
  0x10   :  { %p3808_p7 = pnand %p3807_p6, %p3801_p3 }
  0x12   :  { %3811 = shalt.err (!%p3808_p7)
}
  0x13   :  { %s3935_s13 = smov 384   ;;  %s3936_s14 = smov 24  }
  0x14   :  { %39 = dma.hbm_to_vmem [thread:$0]  %s4116_s2, 36864, %s34_s25, [#allocation8], %s3935_s13, %s3935_s13, %s3936_s14  }
  0x15   :  { %s3937_s17 = smov [#allocation10]   ;;  %s3812_s19 = scalar_lea.hbm %s3987_s28, 6144 }
  0x16   :  { %s59_s18 = sshll.u32 %s3937_s17, 4  ;;  %p3813_p8 = scmp.ne.s32.totalorder %s3987_s28, %s3812_s19  ;;  %s60_s18 = int_to_ptr.vmem [resolvable:$true] %s59_s18 }
  0x17   :  { %s3814_s22 = scalar_lea.hbm %s4118_s4, 12288  ;;  %p3815_p9 = scmp.lt.u32.totalorder %s3987_s28, %s4118_s4 }
  0x18   :  { %p3816_p10 = scmp.lt.u32.totalorder %s3814_s22, %s3812_s19  ;;  %p3818_p12 = scmp.lt.u32.totalorder %s3812_s19, %s3987_s28 }
  0x1a   :  { %p3817_p11 = por %p3816_p10, %p3815_p9 }
  0x1c   :  { %p3819_p13 = por %p3818_p12, %p3817_p11 }
  0x1e   :  { %p3820_p0 = pnand %p3819_p13, %p3813_p8 }
  0x20   :  { %3823 = shalt.err (!%p3820_p0)
}
  0x21   :  { %s3824_s2 = scalar_lea.vmem %s60_s18, 6144  ;;  %p3829_p2 = scmp.lt.s32.totalorder %s60_s18, %s60_s18 }
  0x22   :  { %p3825_p1 = scmp.ne.s32.totalorder %s60_s18, %s3824_s2  ;;  %p3830_p3 = scmp.lt.s32.totalorder %s3824_s2, %s3824_s2 }
  0x24   :  { %p3831_p4 = por %p3830_p3, %p3829_p2 }
  0x26   :  { %p3832_p5 = pnand %p3831_p4, %p3825_p1 }
  0x28   :  { %3835 = shalt.err (!%p3832_p5)
}
  0x29   :  { %s3938_s25 = smov 64   ;;  %s3939_s26 = smov 4  }
  0x2a   :  { %65 = dma.hbm_to_vmem [thread:$0]  %s3987_s28, 6144, %s60_s18, [#allocation11], %s3938_s25, %s3938_s25, %s3939_s26  }
  0x2b   :  { %s3940_s27 = smov [#allocation4]   ;;  %s3941_s4 = smov [#allocation9]  }
  0x2c   :  { %s21_s29 = sshll.u32 %s3940_s27, 4  ;;  %s46_s30 = sshll.u32 %s3941_s4, 4  ;;  %s22_s29 = int_to_ptr.vmem [resolvable:$true] %s21_s29  ;;  %s47_s30 = int_to_ptr.vmem [resolvable:$true] %s46_s30 }
  0x2d   :  { %s3836_s9 = scalar_lea.hbm %s4115_s1, 768 }
  0x2e   :  { %p3837_p6 = scmp.ne.s32.totalorder %s4115_s1, %s3836_s9  ;;  %p3840_p7 = scmp.lt.u32.totalorder %s3836_s9, %s4115_s1 }
  0x30   :  { %p3842_p8 = pnand %p3840_p7, %p3837_p6 }
  0x32   :  { %3845 = shalt.err (!%p3842_p8)
}
  0x33   :  { %s3846_s28 = scalar_lea.vmem %s22_s29, 768  ;;  %p3851_p10 = scmp.lt.s32.totalorder %s22_s29, %s22_s29 }
  0x34   :  { %p3847_p9 = scmp.ne.s32.totalorder %s22_s29, %s3846_s28  ;;  %p3852_p11 = scmp.lt.s32.totalorder %s3846_s28, %s3846_s28 }
  0x36   :  { %p3853_p12 = por %p3852_p11, %p3851_p10 }
  0x38   :  { %p3854_p13 = pnand %p3853_p12, %p3847_p9 }
  0x3a   :  { %3857 = shalt.err (!%p3854_p13)
}
  0x3b   :  { %27 = dma.hbm_to_vmem [thread:$0]  %s4115_s1, 768, %s22_s29, [#allocation5], %s3935_s13, %s3935_s13, %s3936_s14  }
  0x3c   :  { %s3858_s20 = scalar_lea.hbm %s4117_s3, 96 }
  0x3d   :  { %p3859_p0 = scmp.ne.s32.totalorder %s4117_s3, %s3858_s20  ;;  %p3862_p1 = scmp.lt.u32.totalorder %s3858_s20, %s4117_s3 }
  0x3f   :  { %p3864_p2 = pnand %p3862_p1, %p3859_p0 }
  0x41   :  { %3867 = shalt.err (!%p3864_p2)
}
  0x42   :  { %s3868_s2 = scalar_lea.vmem %s47_s30, 96  ;;  %p3873_p4 = scmp.lt.s32.totalorder %s47_s30, %s47_s30 }
  0x43   :  { %p3869_p3 = scmp.ne.s32.totalorder %s47_s30, %s3868_s2  ;;  %p3874_p5 = scmp.lt.s32.totalorder %s3868_s2, %s3868_s2 }
  0x45   :  { %p3875_p6 = por %p3874_p5, %p3873_p4 }
  0x47   :  { %p3876_p7 = pnand %p3875_p6, %p3869_p3 }
  0x49   :  { %3879 = shalt.err (!%p3876_p7)
}
  0x4a   :  { %49 = dma.hbm_to_vmem [thread:$0]  %s4117_s3, 96, %s47_s30, [#allocation8]  }
  0x4b   :  { %s2838_s26 = sshll.u32 %s4114_s0, 4  ;;  %s3942_s7 = smov [#allocation12]  }
  0x4c   :  { %s73_s4 = scalar_lea.hbm %s4119_s5, %s2838_s26  ;;  %s75_s8 = sshll.u32 %s3942_s7, 4  ;;  %s76_s8 = int_to_ptr.vmem [resolvable:$true] %s75_s8 }
  0x4d   :  { %s3880_s9 = scalar_lea.hbm %s73_s4, 16  ;;  %s3882_s12 = scalar_lea.hbm %s4119_s5, 32 }
  0x4e   :  { %p3881_p8 = scmp.ne.s32.totalorder %s73_s4, %s3880_s9  ;;  %p3883_p9 = scmp.lt.u32.totalorder %s73_s4, %s4119_s5 }
  0x4f   :  { %p3884_p10 = scmp.lt.u32.totalorder %s3882_s12, %s3880_s9  ;;  %p3886_p12 = scmp.lt.u32.totalorder %s3880_s9, %s73_s4 }
  0x51   :  { %p3885_p11 = por %p3884_p10, %p3883_p9 }
  0x53   :  { %p3887_p13 = por %p3886_p12, %p3885_p11 }
  0x55   :  { %p3888_p0 = pnand %p3887_p13, %p3881_p8 }
  0x57   :  { %3891 = shalt.err (!%p3888_p0)
}
  0x58   :  { %s3892_s0 = scalar_lea.vmem %s76_s8, 16  ;;  %s3896_s3 = scalar_lea.vmem %s76_s8, 32 }
  0x59   :  { %p3893_p1 = scmp.ne.s32.totalorder %s76_s8, %s3892_s0  ;;  %p3897_p2 = scmp.lt.s32.totalorder %s76_s8, %s76_s8 }
  0x5a   :  { %p3898_p3 = scmp.lt.s32.totalorder %s3896_s3, %s3892_s0 }
  0x5c   :  { %p3899_p4 = por %p3898_p3, %p3897_p2 }
  0x5e   :  { %p3900_p5 = pnand %p3899_p4, %p3893_p1 }
  0x60   :  { %3903 = shalt.err (!%p3900_p5)
}
  0x61   :  { %78 = dma.hbm_to_vmem [thread:$0]  %s73_s4, 16, %s76_s8, [#allocation11]  }
  0x62   :  { %3926 = dma.done.wait [#allocation5], 768  }
  0x63   :  { %3927 = vsyncadd [#allocation5], 4294966528 }
  0x64   :  { %3928 = dma.done.wait [#allocation8], 36960  }
  0x65   :  { %3929 = vsyncadd [#allocation8], 4294930336 }
  0x66   :  { %3930 = dma.done.wait [#allocation11], 6160  }
  0x67   :  { %3931 = vsyncadd [#allocation11], 4294961136  ;;  %v3297_v0 = vld [vmem:[#allocation7 + $0x4] ss:$24 sps:$4 sm:$0xff]   ;;  %v3301_v2 = vld [vmem:[#allocation7] ss:$24 sps:$4 sm:$0xff]  }
  0x68   :  { %v3299_v1 = vld [vmem:[#allocation7 + $0x304] ss:$24 sps:$4 sm:$0xff]   ;;  %1893 = vmatprep.subr.bf16.mxu1 %v3297_v0  ;;  %v3302_v3 = vld [vmem:[#allocation7 + $0x300] ss:$24 sps:$4 sm:$0xff]   ;;  %v3303_v4 = vld [vmem:[#allocation7 + $0x34] ss:$24 sps:$4 sm:$0xff]  }
  0x69   :  { %1936 = vmatprep.subr.bf16.mxu0 %v3299_v1  ;;  %1894 = vmatpush1.bf16.msra.mxu1 %v3301_v2  ;;  %v3305_v5 = vld [vmem:[#allocation7 + $0x334] ss:$24 sps:$4 sm:$0xff]   ;;  %v3307_v6 = vld [vmem:[#allocation7 + $0x30] ss:$24 sps:$4 sm:$0xff]   ;;  %v3309_v8 = vld [vmem:[#allocation7 + $0x64] ss:$24 sps:$4 sm:$0xff]  }
  0x6a   :  { %1937 = vmatpush1.bf16.msra.mxu0 %v3302_v3  ;;  %1895 = vmatprep.subr.bf16.mxu1 %v3303_v4  ;;  %v3308_v7 = vld [vmem:[#allocation7 + $0x330] ss:$24 sps:$4 sm:$0xff]   ;;  %v3311_v9 = vld [vmem:[#allocation7 + $0x364] ss:$24 sps:$4 sm:$0xff]   ;;  %v3313_v10 = vld [vmem:[#allocation7 + $0x60] ss:$24 sps:$4 sm:$0xff]  }
  0x6b   :  { %1938 = vmatprep.subr.bf16.mxu0 %v3305_v5  ;;  %v3314_v11 = vld [vmem:[#allocation7 + $0x360] ss:$24 sps:$4 sm:$0xff]   ;;  %v3315_v12 = vld [vmem:[#allocation7 + $0x94] ss:$24 sps:$4 sm:$0xff]   ;;  %v3319_v14 = vld [vmem:[#allocation7 + $0x90] ss:$24 sps:$4 sm:$0xff]  }
  0x6c   :  { %v3317_v13 = vld [vmem:[#allocation7 + $0x394] ss:$24 sps:$4 sm:$0xff]   ;;  %v3320_v15 = vld [vmem:[#allocation7 + $0x390] ss:$24 sps:$4 sm:$0xff]   ;;  %v3321_v16 = vld [vmem:[#allocation7 + $0xc4] ss:$24 sps:$4 sm:$0xff]  }
  0x6d   :  { %1896 = vmatpush1.bf16.msra.mxu1 %v3307_v6  ;;  %v3323_v17 = vld [vmem:[#allocation7 + $0x3c4] ss:$24 sps:$4 sm:$0xff]   ;;  %v3325_v18 = vld [vmem:[#allocation7 + $0xc0] ss:$24 sps:$4 sm:$0xff]   ;;  %v3327_v20 = vld [vmem:[#allocation7 + $0xf4] ss:$24 sps:$4 sm:$0xff]  }
  0x6e   :  { %1939 = vmatpush1.bf16.msra.mxu0 %v3308_v7  ;;  %1897 = vmatprep.subr.bf16.mxu1 %v3309_v8  ;;  %v3326_v19 = vld [vmem:[#allocation7 + $0x3c0] ss:$24 sps:$4 sm:$0xff]   ;;  %v3329_v21 = vld [vmem:[#allocation7 + $0x3f4] ss:$24 sps:$4 sm:$0xff]   ;;  %v3331_v22 = vld [vmem:[#allocation7 + $0xf0] ss:$24 sps:$4 sm:$0xff]  }
  0x6f   :  { %1940 = vmatprep.subr.bf16.mxu0 %v3311_v9  ;;  %v3332_v23 = vld [vmem:[#allocation7 + $0x3f0] ss:$24 sps:$4 sm:$0xff]   ;;  %v3333_v24 = vld [vmem:[#allocation7 + $0x124] ss:$24 sps:$4 sm:$0xff]   ;;  %v3337_v26 = vld [vmem:[#allocation7 + $0x120] ss:$24 sps:$4 sm:$0xff]  }
  0x70   :  { %v3335_v25 = vld [vmem:[#allocation7 + $0x424] ss:$24 sps:$4 sm:$0xff]   ;;  %v3338_v27 = vld [vmem:[#allocation7 + $0x420] ss:$24 sps:$4 sm:$0xff]   ;;  %v3339_v28 = vld [vmem:[#allocation7 + $0x154] ss:$24 sps:$4 sm:$0xff]  }
  0x71   :  { %1898 = vmatpush1.bf16.msra.mxu1 %v3313_v10  ;;  %v3341_v29 = vld [vmem:[#allocation7 + $0x454] ss:$24 sps:$4 sm:$0xff]   ;;  %v3343_v30 = vld [vmem:[#allocation7 + $0x150] ss:$24 sps:$4 sm:$0xff]   ;;  %v3345_v32 = vld [vmem:[#allocation7 + $0x184] ss:$24 sps:$4 sm:$0xff]  }
  0x72   :  { %1941 = vmatpush1.bf16.msra.mxu0 %v3314_v11  ;;  %1899 = vmatprep.subr.bf16.mxu1 %v3315_v12  ;;  %v3344_v31 = vld [vmem:[#allocation7 + $0x450] ss:$24 sps:$4 sm:$0xff]   ;;  %v3347_v33 = vld [vmem:[#allocation7 + $0x484] ss:$24 sps:$4 sm:$0xff]   ;;  %v3349_v34 = vld [vmem:[#allocation7 + $0x180] ss:$24 sps:$4 sm:$0xff]  }
  0x73   :  { %1942 = vmatprep.subr.bf16.mxu0 %v3317_v13  ;;  %v3350_v35 = vld [vmem:[#allocation7 + $0x480] ss:$24 sps:$4 sm:$0xff]   ;;  %v3351_v36 = vld [vmem:[#allocation7 + $0x1b4] ss:$24 sps:$4 sm:$0xff]   ;;  %v3355_v38 = vld [vmem:[#allocation7 + $0x1b0] ss:$24 sps:$4 sm:$0xff]  }
  0x74   :  { %v3353_v37 = vld [vmem:[#allocation7 + $0x4b4] ss:$24 sps:$4 sm:$0xff]   ;;  %v3356_v39 = vld [vmem:[#allocation7 + $0x4b0] ss:$24 sps:$4 sm:$0xff]   ;;  %v3357_v40 = vld [vmem:[#allocation7 + $0x1e4] ss:$24 sps:$4 sm:$0xff]  }
  0x75   :  { %1900 = vmatpush1.bf16.msra.mxu1 %v3319_v14  ;;  %v3359_v41 = vld [vmem:[#allocation7 + $0x4e4] ss:$24 sps:$4 sm:$0xff]   ;;  %v3361_v42 = vld [vmem:[#allocation7 + $0x1e0] ss:$24 sps:$4 sm:$0xff]   ;;  %v3363_v44 = vld [vmem:[#allocation7 + $0x214] ss:$24 sps:$4 sm:$0xff]  }
  0x76   :  { %1943 = vmatpush1.bf16.msra.mxu0 %v3320_v15  ;;  %1901 = vmatprep.subr.bf16.mxu1 %v3321_v16  ;;  %v3362_v43 = vld [vmem:[#allocation7 + $0x4e0] ss:$24 sps:$4 sm:$0xff]   ;;  %v3365_v45 = vld [vmem:[#allocation7 + $0x514] ss:$24 sps:$4 sm:$0xff]   ;;  %v3367_v46 = vld [vmem:[#allocation7 + $0x210] ss:$24 sps:$4 sm:$0xff]  }
  0x77   :  { %1944 = vmatprep.subr.bf16.mxu0 %v3323_v17  ;;  %v3368_v47 = vld [vmem:[#allocation7 + $0x510] ss:$24 sps:$4 sm:$0xff]   ;;  %v4054_v48 = vld [vmem:[#allocation4 + $0x4] ss:$24 sps:$4 sm:$0xff]   ;;  %v3369_v50 = vld [vmem:[#allocation7 + $0x244] ss:$24 sps:$4 sm:$0xff]  }
  0x78   :  { %v4056_v49 = vld [vmem:[#allocation4 + $0xc] ss:$24 sps:$4 sm:$0xff]   ;;  %1925 = vmatprep.mubr.bf16.mxu1 %v4054_v48  ;;  %v3373_v52 = vld [vmem:[#allocation7 + $0x240] ss:$24 sps:$4 sm:$0xff]   ;;  %v3379_v56 = vld [vmem:[#allocation7 + $0x270] ss:$24 sps:$4 sm:$0xff]  }
  0x79   :  { %1902 = vmatpush1.bf16.msra.mxu1 %v3325_v18  ;;  %v3371_v51 = vld [vmem:[#allocation7 + $0x544] ss:$24 sps:$4 sm:$0xff]   ;;  %1968 = vmatprep.mubr.bf16.mxu0 %v4056_v49  ;;  %v3374_v53 = vld [vmem:[#allocation7 + $0x540] ss:$24 sps:$4 sm:$0xff]   ;;  %v3375_v54 = vld [vmem:[#allocation7 + $0x274] ss:$24 sps:$4 sm:$0xff]  }
  0x7a   :  { %1945 = vmatpush1.bf16.msra.mxu0 %v3326_v19  ;;  %1903 = vmatprep.subr.bf16.mxu1 %v3327_v20  ;;  %v3377_v55 = vld [vmem:[#allocation7 + $0x574] ss:$24 sps:$4 sm:$0xff]   ;;  %v3380_v57 = vld [vmem:[#allocation7 + $0x570] ss:$24 sps:$4 sm:$0xff]   ;;  %v3381_v58 = vld [vmem:[#allocation7 + $0x2a4] ss:$24 sps:$4 sm:$0xff]  }
  0x7b   :  { %1946 = vmatprep.subr.bf16.mxu0 %v3329_v21  ;;  %v3383_v59 = vld [vmem:[#allocation7 + $0x5a4] ss:$24 sps:$4 sm:$0xff]   ;;  %v3385_v60 = vld [vmem:[#allocation7 + $0x2a0] ss:$24 sps:$4 sm:$0xff]   ;;  %v3387_v62 = vld [vmem:[#allocation7 + $0x2d4] ss:$24 sps:$4 sm:$0xff]  }
  0x7c   :  { %v3386_v61 = vld [vmem:[#allocation7 + $0x5a0] ss:$24 sps:$4 sm:$0xff]   ;;  %v3389_v63 = vld [vmem:[#allocation7 + $0x5d4] ss:$24 sps:$4 sm:$0xff]   ;;  %v3391_v0 = vld [vmem:[#allocation7 + $0x2d0] ss:$24 sps:$4 sm:$0xff]  }
  0x7d   :  { %1904 = vmatpush1.bf16.msra.mxu1 %v3331_v22  ;;  %v3392_v1 = vld [vmem:[#allocation7 + $0x5d0] ss:$24 sps:$4 sm:$0xff]   ;;  %v3399_v2 = vld [vmem:[#allocation7 + $0x604] ss:$24 sps:$4 sm:$0xff]   ;;  %v3397_v4 = vld [vmem:[#allocation7 + $0x600] ss:$24 sps:$4 sm:$0xff]  }
  0x7e   :  { %1947 = vmatpush1.bf16.msra.mxu0 %v3332_v23  ;;  %1905 = vmatprep.subr.bf16.mxu1 %v3333_v24  ;;  %v3402_v3 = vld [vmem:[#allocation7 + $0xc] ss:$24 sps:$4 sm:$0xff]   ;;  %v3400_v5 = vld [vmem:[#allocation7 + $0x8] ss:$24 sps:$4 sm:$0xff]   ;;  %v4062_v7 = vld [vmem:[#allocation4 + $0x8] ss:$24 sps:$4 sm:$0xff]  }
  0x7f   :  { %1948 = vmatprep.subr.bf16.mxu0 %v3335_v25  ;;  %v4060_v6 = vld [vmem:[#allocation4] ss:$24 sps:$4 sm:$0xff]   ;;  %v3407_v8 = vld [vmem:[#allocation7 + $0x634] ss:$24 sps:$4 sm:$0xff]   ;;  %v3413_v12 = vld [vmem:[#allocation7 + $0x664] ss:$24 sps:$4 sm:$0xff]  }
  0x80   :  { %v3410_v9 = vld [vmem:[#allocation7 + $0x3c] ss:$24 sps:$4 sm:$0xff]   ;;  %v3405_v10 = vld [vmem:[#allocation7 + $0x630] ss:$24 sps:$4 sm:$0xff]   ;;  %v3416_v13 = vld [vmem:[#allocation7 + $0x6c] ss:$24 sps:$4 sm:$0xff]  }
  0x81   :  { %1906 = vmatpush1.bf16.msra.mxu1 %v3337_v26  ;;  %v3408_v11 = vld [vmem:[#allocation7 + $0x38] ss:$24 sps:$4 sm:$0xff]   ;;  %v3414_v15 = vld [vmem:[#allocation7 + $0x68] ss:$24 sps:$4 sm:$0xff]   ;;  %v3419_v16 = vld [vmem:[#allocation7 + $0x694] ss:$24 sps:$4 sm:$0xff]  }
  0x82   :  { %1949 = vmatpush1.bf16.msra.mxu0 %v3338_v27  ;;  %1907 = vmatprep.subr.bf16.mxu1 %v3339_v28  ;;  %v3411_v14 = vld [vmem:[#allocation7 + $0x660] ss:$24 sps:$4 sm:$0xff]   ;;  %v3422_v17 = vld [vmem:[#allocation7 + $0x9c] ss:$24 sps:$4 sm:$0xff]   ;;  %v3417_v18 = vld [vmem:[#allocation7 + $0x690] ss:$24 sps:$4 sm:$0xff]  }
  0x83   :  { %1950 = vmatprep.subr.bf16.mxu0 %v3341_v29  ;;  %v3420_v19 = vld [vmem:[#allocation7 + $0x98] ss:$24 sps:$4 sm:$0xff]   ;;  %v3425_v20 = vld [vmem:[#allocation7 + $0x6c4] ss:$24 sps:$4 sm:$0xff]   ;;  %v3426_v23 = vld [vmem:[#allocation7 + $0xc8] ss:$24 sps:$4 sm:$0xff]  }
  0x84   :  { %v3428_v21 = vld [vmem:[#allocation7 + $0xcc] ss:$24 sps:$4 sm:$0xff]   ;;  %v3423_v22 = vld [vmem:[#allocation7 + $0x6c0] ss:$24 sps:$4 sm:$0xff]   ;;  %v3434_v25 = vld [vmem:[#allocation7 + $0xfc] ss:$24 sps:$4 sm:$0xff]  }
  0x85   :  { %1908 = vmatpush1.bf16.msra.mxu1 %v3343_v30  ;;  %v3431_v24 = vld [vmem:[#allocation7 + $0x6f4] ss:$24 sps:$4 sm:$0xff]   ;;  %v3429_v26 = vld [vmem:[#allocation7 + $0x6f0] ss:$24 sps:$4 sm:$0xff]   ;;  %v3437_v28 = vld [vmem:[#allocation7 + $0x724] ss:$24 sps:$4 sm:$0xff]  }
  0x86   :  { %1951 = vmatpush1.bf16.msra.mxu0 %v3344_v31  ;;  %1909 = vmatprep.subr.bf16.mxu1 %v3345_v32  ;;  %v3432_v27 = vld [vmem:[#allocation7 + $0xf8] ss:$24 sps:$4 sm:$0xff]   ;;  %v3440_v29 = vld [vmem:[#allocation7 + $0x12c] ss:$24 sps:$4 sm:$0xff]   ;;  %v3438_v31 = vld [vmem:[#allocation7 + $0x128] ss:$24 sps:$4 sm:$0xff]  }
  0x87   :  { %1952 = vmatprep.subr.bf16.mxu0 %v3347_v33  ;;  %v3435_v30 = vld [vmem:[#allocation7 + $0x720] ss:$24 sps:$4 sm:$0xff]   ;;  %v3443_v32 = vld [vmem:[#allocation7 + $0x754] ss:$24 sps:$4 sm:$0xff]   ;;  %s3943_s5 = smov [#allocation13]  }
  0x88   :  { %v3446_v33 = vld [vmem:[#allocation7 + $0x15c] ss:$24 sps:$4 sm:$0xff]   ;;  %s2819_s30 = sshll.u32 %s3943_s5, 4  ;;  %s2820_s30 = int_to_ptr.vmem [resolvable:$true] %s2819_s30 }
  0x89   :  { %1910 = vmatpush1.bf16.msra.mxu1 %v3349_v34  ;;  %v4067_v34 = vld [vmem:[#allocation4 + $0x14] ss:$24 sps:$4 sm:$0xff]   ;;  %s3904_s16 = scalar_lea.vmem %s2820_s30, 256  ;;  %p3909_p7 = scmp.lt.s32.totalorder %s2820_s30, %s2820_s30 }
  0x8a   :  { %1953 = vmatpush1.bf16.msra.mxu0 %v3350_v35  ;;  %1911 = vmatprep.subr.bf16.mxu1 %v3351_v36  ;;  %v3441_v35 = vld [vmem:[#allocation7 + $0x750] ss:$24 sps:$4 sm:$0xff]   ;;  %p3905_p6 = scmp.ne.s32.totalorder %s2820_s30, %s3904_s16  ;;  %p3910_p8 = scmp.lt.s32.totalorder %s3904_s16, %s3904_s16 }
  0x8b   :  { %1954 = vmatprep.subr.bf16.mxu0 %v3353_v37  ;;  %v3444_v36 = vld [vmem:[#allocation7 + $0x158] ss:$24 sps:$4 sm:$0xff]   ;;  %v3449_v37 = vld [vmem:[#allocation7 + $0x784] ss:$24 sps:$4 sm:$0xff]  }
  0x8c   :  { %p3911_p9 = por %p3910_p8, %p3909_p7 }
  0x8d   :  { %1912 = vmatpush1.bf16.msra.mxu1 %v3355_v38  ;;  %v3452_v38 = vld [vmem:[#allocation7 + $0x18c] ss:$24 sps:$4 sm:$0xff]  }
  0x8e   :  { %1955 = vmatpush1.bf16.msra.mxu0 %v3356_v39  ;;  %1913 = vmatprep.subr.bf16.mxu1 %v3357_v40  ;;  %v3447_v39 = vld [vmem:[#allocation7 + $0x780] ss:$24 sps:$4 sm:$0xff]   ;;  %p3912_p10 = pnand %p3911_p9, %p3905_p6 }
  0x8f   :  { %1956 = vmatprep.subr.bf16.mxu0 %v3359_v41  ;;  %v3450_v40 = vld [vmem:[#allocation7 + $0x188] ss:$24 sps:$4 sm:$0xff]   ;;  %v3455_v41 = vld [vmem:[#allocation7 + $0x7b4] ss:$24 sps:$4 sm:$0xff]  }
  0x91   :  { %1914 = vmatpush1.bf16.msra.mxu1 %v3361_v42  ;;  %v3458_v42 = vld [vmem:[#allocation7 + $0x1bc] ss:$24 sps:$4 sm:$0xff]  }
  0x92   :  { %1957 = vmatpush1.bf16.msra.mxu0 %v3362_v43  ;;  %1915 = vmatprep.subr.bf16.mxu1 %v3363_v44  ;;  %v3453_v43 = vld [vmem:[#allocation7 + $0x7b0] ss:$24 sps:$4 sm:$0xff]  }
  0x93   :  { %1958 = vmatprep.subr.bf16.mxu0 %v3365_v45  ;;  %v3456_v44 = vld [vmem:[#allocation7 + $0x1b8] ss:$24 sps:$4 sm:$0xff]   ;;  %v3461_v45 = vld [vmem:[#allocation7 + $0x7e4] ss:$24 sps:$4 sm:$0xff]  }
  0x95   :  { %1916 = vmatpush1.bf16.msra.mxu1 %v3367_v46  ;;  %v3464_v46 = vld [vmem:[#allocation7 + $0x1ec] ss:$24 sps:$4 sm:$0xff]  }
  0x96   :  { %1959 = vmatpush1.bf16.msra.mxu0 %v3368_v47  ;;  %1917 = vmatprep.subr.bf16.mxu1 %v3369_v50  ;;  %v3459_v47 = vld [vmem:[#allocation7 + $0x7e0] ss:$24 sps:$4 sm:$0xff]  }
  0x97   :  { %1960 = vmatprep.subr.bf16.mxu0 %v3371_v51  ;;  %v3462_v50 = vld [vmem:[#allocation7 + $0x1e8] ss:$24 sps:$4 sm:$0xff]   ;;  %v3467_v51 = vld [vmem:[#allocation7 + $0x814] ss:$24 sps:$4 sm:$0xff]  }
  0x99   :  { %1918 = vmatpush1.bf16.msra.mxu1 %v3373_v52  ;;  %v3470_v52 = vld [vmem:[#allocation7 + $0x21c] ss:$24 sps:$4 sm:$0xff]  }
  0x9a   :  { %1961 = vmatpush1.bf16.msra.mxu0 %v3374_v53  ;;  %1919 = vmatprep.subr.bf16.mxu1 %v3375_v54  ;;  %v3465_v53 = vld [vmem:[#allocation7 + $0x810] ss:$24 sps:$4 sm:$0xff]  }
  0x9b   :  { %1962 = vmatprep.subr.bf16.mxu0 %v3377_v55  ;;  %v3468_v54 = vld [vmem:[#allocation7 + $0x218] ss:$24 sps:$4 sm:$0xff]   ;;  %v3473_v55 = vld [vmem:[#allocation7 + $0x844] ss:$24 sps:$4 sm:$0xff]  }
  0x9d   :  { %1920 = vmatpush1.bf16.msra.mxu1 %v3379_v56  ;;  %v3476_v56 = vld [vmem:[#allocation7 + $0x24c] ss:$24 sps:$4 sm:$0xff]  }
  0x9e   :  { %1963 = vmatpush1.bf16.msra.mxu0 %v3380_v57  ;;  %1921 = vmatprep.subr.bf16.mxu1 %v3381_v58  ;;  %v3471_v57 = vld [vmem:[#allocation7 + $0x840] ss:$24 sps:$4 sm:$0xff]  }
  0x9f   :  { %1964 = vmatprep.subr.bf16.mxu0 %v3383_v59  ;;  %v3474_v58 = vld [vmem:[#allocation7 + $0x248] ss:$24 sps:$4 sm:$0xff]   ;;  %v3479_v59 = vld [vmem:[#allocation7 + $0x874] ss:$24 sps:$4 sm:$0xff]  }
  0xa1   :  { %1922 = vmatpush1.bf16.msra.mxu1 %v3385_v60  ;;  %v3482_v60 = vld [vmem:[#allocation7 + $0x27c] ss:$24 sps:$4 sm:$0xff]  }
  0xa2   :  { %1965 = vmatpush1.bf16.msra.mxu0 %v3386_v61  ;;  %1923 = vmatprep.subr.bf16.mxu1 %v3387_v62  ;;  %v3477_v61 = vld [vmem:[#allocation7 + $0x870] ss:$24 sps:$4 sm:$0xff]  }
  0xa3   :  { %1966 = vmatprep.subr.bf16.mxu0 %v3389_v63  ;;  %v3480_v62 = vld [vmem:[#allocation7 + $0x278] ss:$24 sps:$4 sm:$0xff]   ;;  %v3485_v63 = vld [vmem:[#allocation7 + $0x8a4] ss:$24 sps:$4 sm:$0xff]  }
  0xa5   :  { %1924 = vmatpush1.bf16.msra.mxu1 %v3391_v0  ;;  %v3488_v0 = vld [vmem:[#allocation7 + $0x2ac] ss:$24 sps:$4 sm:$0xff]  }
  0xa6   :  { %1967 = vmatpush1.bf16.msra.mxu0 %v3392_v1  ;;  %2022 = vmatprep.subr.bf16.mxu1 %v3402_v3  ;;  %v3483_v1 = vld [vmem:[#allocation7 + $0x8a0] ss:$24 sps:$4 sm:$0xff]   ;;  %v3491_v3 = vld [vmem:[#allocation7 + $0x8d4] ss:$24 sps:$4 sm:$0xff]  }
  0xa7   :  { %1979 = vmatprep.subr.bf16.mxu0 %v3399_v2  ;;  %v3486_v2 = vld [vmem:[#allocation7 + $0x2a8] ss:$24 sps:$4 sm:$0xff]  }
  0xa8   :  { %1926 = vmatmul.mubr.bf16.vlgmr.msra.gmra.mrb[0].mxu1 %v4060_v6 }
  0xa9   :  { %1969 = vmatmul.mubr.bf16.vlgmr.msra.gmra.mrb[0].mxu0 %v4062_v7  ;;  %2023 = vmatpush1.bf16.msra.mxu1 %v3400_v5  ;;  %v3489_v5 = vld [vmem:[#allocation7 + $0x8d0] ss:$24 sps:$4 sm:$0xff]  }
  0xaa   :  { %1980 = vmatpush1.bf16.msra.mxu0 %v3397_v4  ;;  %2024 = vmatprep.subr.bf16.mxu1 %v3410_v9  ;;  %v3494_v4 = vld [vmem:[#allocation7 + $0x2dc] ss:$24 sps:$4 sm:$0xff]   ;;  %v3500_v9 = vld [vmem:[#allocation7 + $0x30c] ss:$24 sps:$4 sm:$0xff]  }
  0xab   :  { %1981 = vmatprep.subr.bf16.mxu0 %v3407_v8  ;;  %2054 = vmatprep.mubr.bf16.mxu1 %v4054_v48  ;;  %v3492_v8 = vld [vmem:[#allocation7 + $0x2d8] ss:$24 sps:$4 sm:$0xff]  }
  0xac   :  { %2011 = vmatprep.mubr.bf16.mxu0 %v4067_v34 }
  0xad   :  { %2025 = vmatpush1.bf16.msra.mxu1 %v3408_v11  ;;  %v4070_v11 = vld [vmem:[#allocation4 + $0x10] ss:$24 sps:$4 sm:$0xff]  }
  0xae   :  { %1982 = vmatpush1.bf16.msra.mxu0 %v3405_v10  ;;  %2026 = vmatprep.subr.bf16.mxu1 %v3416_v13  ;;  %v3503_v10 = vld [vmem:[#allocation7 + $0x14] ss:$24 sps:$4 sm:$0xff]   ;;  %v3501_v13 = vld [vmem:[#allocation7 + $0x10] ss:$24 sps:$4 sm:$0xff]  }
  0xaf   :  { %1983 = vmatprep.subr.bf16.mxu0 %v3413_v12  ;;  %v3498_v12 = vld [vmem:[#allocation7 + $0x308] ss:$24 sps:$4 sm:$0xff]  }
  0xb1   :  { %2027 = vmatpush1.bf16.msra.mxu1 %v3414_v15  ;;  %v3509_v15 = vld [vmem:[#allocation7 + $0x44] ss:$24 sps:$4 sm:$0xff]  }
  0xb2   :  { %1984 = vmatpush1.bf16.msra.mxu0 %v3411_v14  ;;  %2028 = vmatprep.subr.bf16.mxu1 %v3422_v17  ;;  %v3506_v14 = vld [vmem:[#allocation7 + $0x33c] ss:$24 sps:$4 sm:$0xff]   ;;  %v3507_v17 = vld [vmem:[#allocation7 + $0x40] ss:$24 sps:$4 sm:$0xff]  }
  0xb3   :  { %1985 = vmatprep.subr.bf16.mxu0 %v3419_v16  ;;  %v3504_v16 = vld [vmem:[#allocation7 + $0x338] ss:$24 sps:$4 sm:$0xff]  }
  0xb5   :  { %2029 = vmatpush1.bf16.msra.mxu1 %v3420_v19  ;;  %v3515_v19 = vld [vmem:[#allocation7 + $0x74] ss:$24 sps:$4 sm:$0xff]  }
  0xb6   :  { %1986 = vmatpush1.bf16.msra.mxu0 %v3417_v18  ;;  %2030 = vmatprep.subr.bf16.mxu1 %v3428_v21  ;;  %v3512_v18 = vld [vmem:[#allocation7 + $0x36c] ss:$24 sps:$4 sm:$0xff]   ;;  %v3513_v21 = vld [vmem:[#allocation7 + $0x70] ss:$24 sps:$4 sm:$0xff]  }
  0xb7   :  { %1987 = vmatprep.subr.bf16.mxu0 %v3425_v20  ;;  %v3510_v20 = vld [vmem:[#allocation7 + $0x368] ss:$24 sps:$4 sm:$0xff]  }
  0xb9   :  { %2031 = vmatpush1.bf16.msra.mxu1 %v3426_v23  ;;  %v3521_v23 = vld [vmem:[#allocation7 + $0xa4] ss:$24 sps:$4 sm:$0xff]  }
  0xba   :  { %1988 = vmatpush1.bf16.msra.mxu0 %v3423_v22  ;;  %2032 = vmatprep.subr.bf16.mxu1 %v3434_v25  ;;  %v3518_v22 = vld [vmem:[#allocation7 + $0x39c] ss:$24 sps:$4 sm:$0xff]   ;;  %v3519_v25 = vld [vmem:[#allocation7 + $0xa0] ss:$24 sps:$4 sm:$0xff]  }
  0xbb   :  { %1989 = vmatprep.subr.bf16.mxu0 %v3431_v24  ;;  %v3516_v24 = vld [vmem:[#allocation7 + $0x398] ss:$24 sps:$4 sm:$0xff]  }
  0xbd   :  { %2033 = vmatpush1.bf16.msra.mxu1 %v3432_v27  ;;  %v3527_v27 = vld [vmem:[#allocation7 + $0xd4] ss:$24 sps:$4 sm:$0xff]  }
  0xbe   :  { %1990 = vmatpush1.bf16.msra.mxu0 %v3429_v26  ;;  %2034 = vmatprep.subr.bf16.mxu1 %v3440_v29  ;;  %v3524_v26 = vld [vmem:[#allocation7 + $0x3cc] ss:$24 sps:$4 sm:$0xff]  }
  0xbf   :  { %1991 = vmatprep.subr.bf16.mxu0 %v3437_v28  ;;  %v3522_v28 = vld [vmem:[#allocation7 + $0x3c8] ss:$24 sps:$4 sm:$0xff]   ;;  %v3533_v29 = vld [vmem:[#allocation7 + $0x104] ss:$24 sps:$4 sm:$0xff]  }
  0xc1   :  { %2035 = vmatpush1.bf16.msra.mxu1 %v3438_v31  ;;  %v3531_v31 = vld [vmem:[#allocation7 + $0x100] ss:$24 sps:$4 sm:$0xff]  }
  0xc2   :  { %1992 = vmatpush1.bf16.msra.mxu0 %v3435_v30  ;;  %2036 = vmatprep.subr.bf16.mxu1 %v3446_v33  ;;  %v3528_v30 = vld [vmem:[#allocation7 + $0x3f8] ss:$24 sps:$4 sm:$0xff]   ;;  %v3539_v33 = vld [vmem:[#allocation7 + $0x134] ss:$24 sps:$4 sm:$0xff]  }
  0xc3   :  { %1993 = vmatprep.subr.bf16.mxu0 %v3443_v32  ;;  %v3536_v32 = vld [vmem:[#allocation7 + $0x42c] ss:$24 sps:$4 sm:$0xff]  }
  0xc5   :  { %2037 = vmatpush1.bf16.msra.mxu1 %v3444_v36  ;;  %v3537_v36 = vld [vmem:[#allocation7 + $0x130] ss:$24 sps:$4 sm:$0xff]  }
  0xc6   :  { %1994 = vmatpush1.bf16.msra.mxu0 %v3441_v35  ;;  %2038 = vmatprep.subr.bf16.mxu1 %v3452_v38  ;;  %v3534_v35 = vld [vmem:[#allocation7 + $0x428] ss:$24 sps:$4 sm:$0xff]   ;;  %v3545_v38 = vld [vmem:[#allocation7 + $0x164] ss:$24 sps:$4 sm:$0xff]  }
  0xc7   :  { %1995 = vmatprep.subr.bf16.mxu0 %v3449_v37  ;;  %v3542_v37 = vld [vmem:[#allocation7 + $0x45c] ss:$24 sps:$4 sm:$0xff]  }
  0xc9   :  { %2039 = vmatpush1.bf16.msra.mxu1 %v3450_v40  ;;  %v3543_v40 = vld [vmem:[#allocation7 + $0x160] ss:$24 sps:$4 sm:$0xff]  }
  0xca   :  { %1996 = vmatpush1.bf16.msra.mxu0 %v3447_v39  ;;  %2040 = vmatprep.subr.bf16.mxu1 %v3458_v42  ;;  %v3540_v39 = vld [vmem:[#allocation7 + $0x458] ss:$24 sps:$4 sm:$0xff]   ;;  %v3551_v42 = vld [vmem:[#allocation7 + $0x194] ss:$24 sps:$4 sm:$0xff]  }
  0xcb   :  { %1997 = vmatprep.subr.bf16.mxu0 %v3455_v41  ;;  %v3548_v41 = vld [vmem:[#allocation7 + $0x48c] ss:$24 sps:$4 sm:$0xff]  }
  0xcd   :  { %2041 = vmatpush1.bf16.msra.mxu1 %v3456_v44  ;;  %v3549_v44 = vld [vmem:[#allocation7 + $0x190] ss:$24 sps:$4 sm:$0xff]  }
  0xce   :  { %1998 = vmatpush1.bf16.msra.mxu0 %v3453_v43  ;;  %2042 = vmatprep.subr.bf16.mxu1 %v3464_v46  ;;  %v3546_v43 = vld [vmem:[#allocation7 + $0x488] ss:$24 sps:$4 sm:$0xff]   ;;  %v3557_v46 = vld [vmem:[#allocation7 + $0x1c4] ss:$24 sps:$4 sm:$0xff]  }
  0xcf   :  { %1999 = vmatprep.subr.bf16.mxu0 %v3461_v45  ;;  %v3554_v45 = vld [vmem:[#allocation7 + $0x4bc] ss:$24 sps:$4 sm:$0xff]  }
  0xd1   :  { %2043 = vmatpush1.bf16.msra.mxu1 %v3462_v50  ;;  %v3555_v50 = vld [vmem:[#allocation7 + $0x1c0] ss:$24 sps:$4 sm:$0xff]  }
  0xd2   :  { %2000 = vmatpush1.bf16.msra.mxu0 %v3459_v47  ;;  %2044 = vmatprep.subr.bf16.mxu1 %v3470_v52  ;;  %v3552_v47 = vld [vmem:[#allocation7 + $0x4b8] ss:$24 sps:$4 sm:$0xff]   ;;  %v3563_v52 = vld [vmem:[#allocation7 + $0x1f4] ss:$24 sps:$4 sm:$0xff]  }
  0xd3   :  { %2001 = vmatprep.subr.bf16.mxu0 %v3467_v51  ;;  %v3560_v51 = vld [vmem:[#allocation7 + $0x4ec] ss:$24 sps:$4 sm:$0xff]  }
  0xd5   :  { %2045 = vmatpush1.bf16.msra.mxu1 %v3468_v54  ;;  %v3561_v54 = vld [vmem:[#allocation7 + $0x1f0] ss:$24 sps:$4 sm:$0xff]  }
  0xd6   :  { %2002 = vmatpush1.bf16.msra.mxu0 %v3465_v53  ;;  %2046 = vmatprep.subr.bf16.mxu1 %v3476_v56  ;;  %v3558_v53 = vld [vmem:[#allocation7 + $0x4e8] ss:$24 sps:$4 sm:$0xff]   ;;  %v3569_v56 = vld [vmem:[#allocation7 + $0x224] ss:$24 sps:$4 sm:$0xff]  }
  0xd7   :  { %2003 = vmatprep.subr.bf16.mxu0 %v3473_v55  ;;  %v3566_v55 = vld [vmem:[#allocation7 + $0x51c] ss:$24 sps:$4 sm:$0xff]  }
  0xd9   :  { %2047 = vmatpush1.bf16.msra.mxu1 %v3474_v58  ;;  %v3567_v58 = vld [vmem:[#allocation7 + $0x220] ss:$24 sps:$4 sm:$0xff]  }
  0xda   :  { %2004 = vmatpush1.bf16.msra.mxu0 %v3471_v57  ;;  %2048 = vmatprep.subr.bf16.mxu1 %v3482_v60  ;;  %v3564_v57 = vld [vmem:[#allocation7 + $0x518] ss:$24 sps:$4 sm:$0xff]   ;;  %v3575_v60 = vld [vmem:[#allocation7 + $0x254] ss:$24 sps:$4 sm:$0xff]  }
  0xdb   :  { %2005 = vmatprep.subr.bf16.mxu0 %v3479_v59  ;;  %v3572_v59 = vld [vmem:[#allocation7 + $0x54c] ss:$24 sps:$4 sm:$0xff]  }
  0xdd   :  { %2049 = vmatpush1.bf16.msra.mxu1 %v3480_v62  ;;  %v3573_v62 = vld [vmem:[#allocation7 + $0x250] ss:$24 sps:$4 sm:$0xff]  }
  0xde   :  { %2006 = vmatpush1.bf16.msra.mxu0 %v3477_v61  ;;  %2050 = vmatprep.subr.bf16.mxu1 %v3488_v0  ;;  %v3570_v61 = vld [vmem:[#allocation7 + $0x548] ss:$24 sps:$4 sm:$0xff]   ;;  %v3581_v0 = vld [vmem:[#allocation7 + $0x284] ss:$24 sps:$4 sm:$0xff]  }
  0xdf   :  { %2007 = vmatprep.subr.bf16.mxu0 %v3485_v63  ;;  %v3578_v63 = vld [vmem:[#allocation7 + $0x57c] ss:$24 sps:$4 sm:$0xff]  }
  0xe1   :  { %2051 = vmatpush1.bf16.msra.mxu1 %v3486_v2  ;;  %v3579_v2 = vld [vmem:[#allocation7 + $0x280] ss:$24 sps:$4 sm:$0xff]  }
  0xe2   :  { %2008 = vmatpush1.bf16.msra.mxu0 %v3483_v1  ;;  %2052 = vmatprep.subr.bf16.mxu1 %v3494_v4  ;;  %v3576_v1 = vld [vmem:[#allocation7 + $0x578] ss:$24 sps:$4 sm:$0xff]   ;;  %v3587_v4 = vld [vmem:[#allocation7 + $0x2b4] ss:$24 sps:$4 sm:$0xff]  }
  0xe3   :  { %2009 = vmatprep.subr.bf16.mxu0 %v3491_v3  ;;  %v3584_v3 = vld [vmem:[#allocation7 + $0x5ac] ss:$24 sps:$4 sm:$0xff]  }
  0xe5   :  { %2053 = vmatpush1.bf16.msra.mxu1 %v3492_v8  ;;  %v3585_v8 = vld [vmem:[#allocation7 + $0x2b0] ss:$24 sps:$4 sm:$0xff]  }
  0xe6   :  { %2010 = vmatpush1.bf16.msra.mxu0 %v3489_v5  ;;  %2065 = vmatprep.subr.bf16.mxu1 %v3500_v9  ;;  %v3582_v5 = vld [vmem:[#allocation7 + $0x5a8] ss:$24 sps:$4 sm:$0xff]   ;;  %v3590_v9 = vld [vmem:[#allocation7 + $0x5dc] ss:$24 sps:$4 sm:$0xff]  }
  0xe7   :  { %2151 = vmatprep.subr.bf16.mxu0 %v3503_v10  ;;  %v3593_v10 = vld [vmem:[#allocation7 + $0x2e4] ss:$24 sps:$4 sm:$0xff]  }
  0xe8   :  { %2055 = vmatmul.mubr.bf16.vlgmr.msra.gmra.mrb[4].mxu1 %v4060_v6 }
  0xe9   :  { %2012 = vmatmul.mubr.bf16.vlgmr.msra.gmra.mrb[0].mxu0 %v4070_v11  ;;  %2066 = vmatpush1.bf16.msra.mxu1 %v3498_v12  ;;  %v3588_v12 = vld [vmem:[#allocation7 + $0x5d8] ss:$24 sps:$4 sm:$0xff]  }
  0xea   :  { %2152 = vmatpush1.bf16.msra.mxu0 %v3501_v13  ;;  %2067 = vmatprep.subr.bf16.mxu1 %v3506_v14  ;;  %v3591_v13 = vld [vmem:[#allocation7 + $0x2e0] ss:$24 sps:$4 sm:$0xff]   ;;  %v3596_v14 = vld [vmem:[#allocation7 + $0x60c] ss:$24 sps:$4 sm:$0xff]  }
  0xeb   :  { %2153 = vmatprep.subr.bf16.mxu0 %v3509_v15  ;;  %2097 = vmatprep.mubr.bf16.mxu1 %v4056_v49  ;;  %v3525_v49 = vld [vmem:[#allocation7 + $0xd0] ss:$24 sps:$4 sm:$0xff]   ;;  %v3599_v15 = vld [vmem:[#allocation7 + $0x314] ss:$24 sps:$4 sm:$0xff]  }
  0xec   :  { %2183 = vmatprep.mubr.bf16.mxu0 %v4054_v48  ;;  %v3530_v48 = vld [vmem:[#allocation7 + $0x3fc] ss:$24 sps:$4 sm:$0xff]  }
  0xed   :  { %2068 = vmatpush1.bf16.msra.mxu1 %v3504_v16  ;;  %v3594_v16 = vld [vmem:[#allocation7 + $0x608] ss:$24 sps:$4 sm:$0xff]  }
  0xee   :  { %2154 = vmatpush1.bf16.msra.mxu0 %v3507_v17  ;;  %2069 = vmatprep.subr.bf16.mxu1 %v3512_v18  ;;  %v3597_v17 = vld [vmem:[#allocation7 + $0x310] ss:$24 sps:$4 sm:$0xff]   ;;  %v3602_v18 = vld [vmem:[#allocation7 + $0x63c] ss:$24 sps:$4 sm:$0xff]  }
  0xef   :  { %2155 = vmatprep.subr.bf16.mxu0 %v3515_v19  ;;  %v3605_v19 = vld [vmem:[#allocation7 + $0x344] ss:$24 sps:$4 sm:$0xff]  }
  0xf1   :  { %2070 = vmatpush1.bf16.msra.mxu1 %v3510_v20  ;;  %v3600_v20 = vld [vmem:[#allocation7 + $0x638] ss:$24 sps:$4 sm:$0xff]  }
  0xf2   :  { %2156 = vmatpush1.bf16.msra.mxu0 %v3513_v21  ;;  %2071 = vmatprep.subr.bf16.mxu1 %v3518_v22  ;;  %v3603_v21 = vld [vmem:[#allocation7 + $0x340] ss:$24 sps:$4 sm:$0xff]   ;;  %v3608_v22 = vld [vmem:[#allocation7 + $0x66c] ss:$24 sps:$4 sm:$0xff]  }
  0xf3   :  { %2157 = vmatprep.subr.bf16.mxu0 %v3521_v23  ;;  %v3611_v23 = vld [vmem:[#allocation7 + $0x374] ss:$24 sps:$4 sm:$0xff]  }
  0xf5   :  { %2072 = vmatpush1.bf16.msra.mxu1 %v3516_v24  ;;  %v3606_v24 = vld [vmem:[#allocation7 + $0x668] ss:$24 sps:$4 sm:$0xff]  }
  0xf6   :  { %2158 = vmatpush1.bf16.msra.mxu0 %v3519_v25  ;;  %2073 = vmatprep.subr.bf16.mxu1 %v3524_v26  ;;  %v3786_v25 = vld [vmem:[#allocation4 + $0xc] ss:$24 sps:$4 sm:$0xff]   ;;  %v3609_v26 = vld [vmem:[#allocation7 + $0x370] ss:$24 sps:$4 sm:$0xff]  }
  0xf7   :  { %2159 = vmatprep.subr.bf16.mxu0 %v3527_v27  ;;  %v3614_v27 = vld [vmem:[#allocation7 + $0x69c] ss:$24 sps:$4 sm:$0xff]  }
  0xf9   :  { %2074 = vmatpush1.bf16.msra.mxu1 %v3522_v28  ;;  %v3615_v28 = vld [vmem:[#allocation7 + $0x3a0] ss:$24 sps:$4 sm:$0xff]  }
  0xfa   :  { %2160 = vmatpush1.bf16.msra.mxu0 %v3525_v49  ;;  %2075 = vmatprep.subr.bf16.mxu1 %v3530_v48  ;;  %v3620_v49 = vld [vmem:[#allocation7 + $0x6cc] ss:$24 sps:$4 sm:$0xff]  }
  0xfb   :  { %2161 = vmatprep.subr.bf16.mxu0 %v3533_v29  ;;  %v3623_v48 = vld [vmem:[#allocation7 + $0x3d4] ss:$24 sps:$4 sm:$0xff]   ;;  %v3618_v29 = vld [vmem:[#allocation7 + $0x6c8] ss:$24 sps:$4 sm:$0xff]  }
  0xfd   :  { %2076 = vmatpush1.bf16.msra.mxu1 %v3528_v30  ;;  %v3621_v30 = vld [vmem:[#allocation7 + $0x3d0] ss:$24 sps:$4 sm:$0xff]  }
  0xfe   :  { %2162 = vmatpush1.bf16.msra.mxu0 %v3531_v31  ;;  %2077 = vmatprep.subr.bf16.mxu1 %v3536_v32  ;;  %v3629_v31 = vld [vmem:[#allocation7 + $0x404] ss:$24 sps:$4 sm:$0xff]   ;;  %v3624_v32 = vld [vmem:[#allocation7 + $0x6f8] ss:$24 sps:$4 sm:$0xff]  }
  0xff   :  { %2163 = vmatprep.subr.bf16.mxu0 %v3539_v33  ;;  %v3627_v33 = vld [vmem:[#allocation7 + $0x400] ss:$24 sps:$4 sm:$0xff]  }
 0x101   :  { %2078 = vmatpush1.bf16.msra.mxu1 %v3534_v35  ;;  %v3632_v35 = vld [vmem:[#allocation7 + $0x72c] ss:$24 sps:$4 sm:$0xff]  }
 0x102   :  { %2164 = vmatpush1.bf16.msra.mxu0 %v3537_v36  ;;  %2079 = vmatprep.subr.bf16.mxu1 %v3542_v37  ;;  %v3635_v36 = vld [vmem:[#allocation7 + $0x434] ss:$24 sps:$4 sm:$0xff]   ;;  %v3630_v37 = vld [vmem:[#allocation7 + $0x728] ss:$24 sps:$4 sm:$0xff]  }
 0x103   :  { %2165 = vmatprep.subr.bf16.mxu0 %v3545_v38  ;;  %v3633_v38 = vld [vmem:[#allocation7 + $0x430] ss:$24 sps:$4 sm:$0xff]  }
 0x105   :  { %2080 = vmatpush1.bf16.msra.mxu1 %v3540_v39  ;;  %v3638_v39 = vld [vmem:[#allocation7 + $0x75c] ss:$24 sps:$4 sm:$0xff]  }
 0x106   :  { %2166 = vmatpush1.bf16.msra.mxu0 %v3543_v40  ;;  %2081 = vmatprep.subr.bf16.mxu1 %v3548_v41  ;;  %v3641_v40 = vld [vmem:[#allocation7 + $0x464] ss:$24 sps:$4 sm:$0xff]   ;;  %v3636_v41 = vld [vmem:[#allocation7 + $0x758] ss:$24 sps:$4 sm:$0xff]  }
 0x107   :  { %2167 = vmatprep.subr.bf16.mxu0 %v3551_v42  ;;  %v3639_v42 = vld [vmem:[#allocation7 + $0x460] ss:$24 sps:$4 sm:$0xff]  }
 0x109   :  { %2082 = vmatpush1.bf16.msra.mxu1 %v3546_v43  ;;  %v3644_v43 = vld [vmem:[#allocation7 + $0x78c] ss:$24 sps:$4 sm:$0xff]  }
 0x10a   :  { %2168 = vmatpush1.bf16.msra.mxu0 %v3549_v44  ;;  %2083 = vmatprep.subr.bf16.mxu1 %v3554_v45  ;;  %v3647_v44 = vld [vmem:[#allocation7 + $0x494] ss:$24 sps:$4 sm:$0xff]   ;;  %v3642_v45 = vld [vmem:[#allocation7 + $0x788] ss:$24 sps:$4 sm:$0xff]  }
 0x10b   :  { %2169 = vmatprep.subr.bf16.mxu0 %v3557_v46  ;;  %v3645_v46 = vld [vmem:[#allocation7 + $0x490] ss:$24 sps:$4 sm:$0xff]  }
 0x10d   :  { %2084 = vmatpush1.bf16.msra.mxu1 %v3552_v47  ;;  %v3650_v47 = vld [vmem:[#allocation7 + $0x7bc] ss:$24 sps:$4 sm:$0xff]  }
 0x10e   :  { %2170 = vmatpush1.bf16.msra.mxu0 %v3555_v50  ;;  %2085 = vmatprep.subr.bf16.mxu1 %v3560_v51  ;;  %v3653_v50 = vld [vmem:[#allocation7 + $0x4c4] ss:$24 sps:$4 sm:$0xff]   ;;  %v3648_v51 = vld [vmem:[#allocation7 + $0x7b8] ss:$24 sps:$4 sm:$0xff]  }
 0x10f   :  { %2171 = vmatprep.subr.bf16.mxu0 %v3563_v52  ;;  %v3651_v52 = vld [vmem:[#allocation7 + $0x4c0] ss:$24 sps:$4 sm:$0xff]  }
 0x111   :  { %2086 = vmatpush1.bf16.msra.mxu1 %v3558_v53  ;;  %v3656_v53 = vld [vmem:[#allocation7 + $0x7ec] ss:$24 sps:$4 sm:$0xff]  }
 0x112   :  { %2172 = vmatpush1.bf16.msra.mxu0 %v3561_v54  ;;  %2087 = vmatprep.subr.bf16.mxu1 %v3566_v55  ;;  %v3659_v54 = vld [vmem:[#allocation7 + $0x4f4] ss:$24 sps:$4 sm:$0xff]   ;;  %v3654_v55 = vld [vmem:[#allocation7 + $0x7e8] ss:$24 sps:$4 sm:$0xff]  }
 0x113   :  { %2173 = vmatprep.subr.bf16.mxu0 %v3569_v56  ;;  %v3657_v56 = vld [vmem:[#allocation7 + $0x4f0] ss:$24 sps:$4 sm:$0xff]  }
 0x115   :  { %2088 = vmatpush1.bf16.msra.mxu1 %v3564_v57  ;;  %v3662_v57 = vld [vmem:[#allocation7 + $0x81c] ss:$24 sps:$4 sm:$0xff]  }
 0x116   :  { %2174 = vmatpush1.bf16.msra.mxu0 %v3567_v58  ;;  %2089 = vmatprep.subr.bf16.mxu1 %v3572_v59  ;;  %v3665_v58 = vld [vmem:[#allocation7 + $0x524] ss:$24 sps:$4 sm:$0xff]   ;;  %v3660_v59 = vld [vmem:[#allocation7 + $0x818] ss:$24 sps:$4 sm:$0xff]  }
 0x117   :  { %2175 = vmatprep.subr.bf16.mxu0 %v3575_v60  ;;  %v3663_v60 = vld [vmem:[#allocation7 + $0x520] ss:$24 sps:$4 sm:$0xff]  }
 0x119   :  { %2090 = vmatpush1.bf16.msra.mxu1 %v3570_v61  ;;  %v3668_v61 = vld [vmem:[#allocation7 + $0x84c] ss:$24 sps:$4 sm:$0xff]  }
 0x11a   :  { %2176 = vmatpush1.bf16.msra.mxu0 %v3573_v62  ;;  %2091 = vmatprep.subr.bf16.mxu1 %v3578_v63  ;;  %v3671_v62 = vld [vmem:[#allocation7 + $0x554] ss:$24 sps:$4 sm:$0xff]   ;;  %v3666_v63 = vld [vmem:[#allocation7 + $0x848] ss:$24 sps:$4 sm:$0xff]  }
 0x11b   :  { %2177 = vmatprep.subr.bf16.mxu0 %v3581_v0  ;;  %v3669_v0 = vld [vmem:[#allocation7 + $0x550] ss:$24 sps:$4 sm:$0xff]  }
 0x11d   :  { %2092 = vmatpush1.bf16.msra.mxu1 %v3576_v1  ;;  %v3674_v1 = vld [vmem:[#allocation7 + $0x87c] ss:$24 sps:$4 sm:$0xff]  }
 0x11e   :  { %2178 = vmatpush1.bf16.msra.mxu0 %v3579_v2  ;;  %2093 = vmatprep.subr.bf16.mxu1 %v3584_v3  ;;  %v3677_v2 = vld [vmem:[#allocation7 + $0x584] ss:$24 sps:$4 sm:$0xff]   ;;  %v3672_v3 = vld [vmem:[#allocation7 + $0x878] ss:$24 sps:$4 sm:$0xff]  }
 0x11f   :  { %2179 = vmatprep.subr.bf16.mxu0 %v3587_v4  ;;  %v3675_v4 = vld [vmem:[#allocation7 + $0x580] ss:$24 sps:$4 sm:$0xff]  }
 0x121   :  { %2094 = vmatpush1.bf16.msra.mxu1 %v3582_v5  ;;  %v3680_v5 = vld [vmem:[#allocation7 + $0x8ac] ss:$24 sps:$4 sm:$0xff]  }
 0x122   :  { %2180 = vmatpush1.bf16.msra.mxu0 %v3585_v8  ;;  %2095 = vmatprep.subr.bf16.mxu1 %v3590_v9  ;;  %v3683_v8 = vld [vmem:[#allocation7 + $0x5b4] ss:$24 sps:$4 sm:$0xff]   ;;  %v3678_v9 = vld [vmem:[#allocation7 + $0x8a8] ss:$24 sps:$4 sm:$0xff]  }
 0x123   :  { %2181 = vmatprep.subr.bf16.mxu0 %v3593_v10  ;;  %v3681_v10 = vld [vmem:[#allocation7 + $0x5b0] ss:$24 sps:$4 sm:$0xff]  }
 0x125   :  { %2096 = vmatpush1.bf16.msra.mxu1 %v3588_v12  ;;  %v3686_v12 = vld [vmem:[#allocation7 + $0x8dc] ss:$24 sps:$4 sm:$0xff]  }
 0x126   :  { %2182 = vmatpush1.bf16.msra.mxu0 %v3591_v13  ;;  %2108 = vmatprep.subr.bf16.mxu1 %v3596_v14  ;;  %v3689_v13 = vld [vmem:[#allocation7 + $0x5e4] ss:$24 sps:$4 sm:$0xff]   ;;  %v3684_v14 = vld [vmem:[#allocation7 + $0x8d8] ss:$24 sps:$4 sm:$0xff]  }
 0x127   :  { %2194 = vmatprep.subr.bf16.mxu0 %v3599_v15  ;;  %v3687_v15 = vld [vmem:[#allocation7 + $0x5e0] ss:$24 sps:$4 sm:$0xff]  }
 0x128   :  { %2098 = vmatmul.mubr.bf16.vlgmr.msra.gmra.mrb[4].mxu1 %v4062_v7  ;;  %v3617_v7 = vld [vmem:[#allocation7 + $0x3a4] ss:$24 sps:$4 sm:$0xff]  }
 0x129   :  { %2184 = vmatmul.mubr.bf16.vlgmr.msra.gmra.mrb[4].mxu0 %v4060_v6  ;;  %2109 = vmatpush1.bf16.msra.mxu1 %v3594_v16  ;;  %v3612_v6 = vld [vmem:[#allocation7 + $0x698] ss:$24 sps:$4 sm:$0xff]   ;;  %v3692_v16 = vld [vmem:[#allocation7 + $0x614] ss:$24 sps:$4 sm:$0xff]  }
 0x12a   :  { %2195 = vmatpush1.bf16.msra.mxu0 %v3597_v17  ;;  %2110 = vmatprep.subr.bf16.mxu1 %v3602_v18  ;;  %v3738_v17 = vld [vmem:[#allocation10 + $0x40] sm:$0xff]  }
 0x12b   :  { %2196 = vmatprep.subr.bf16.mxu0 %v3605_v19  ;;  %2140 = vmatprep.mubr.bf16.mxu1 %v4067_v34  ;;  %v3626_v34 = vld [vmem:[#allocation7 + $0x6fc] ss:$24 sps:$4 sm:$0xff]   ;;  %v3690_v18 = vld [vmem:[#allocation7 + $0x610] ss:$24 sps:$4 sm:$0xff]  }
 0x12c   :  { %2226 = vmatprep.mubr.bf16.mxu0 %v3786_v25  ;;  %v3695_v19 = vld [vmem:[#allocation7 + $0x644] ss:$24 sps:$4 sm:$0xff]   ;;  %v3698_v25 = vld [vmem:[#allocation7 + $0x674] ss:$24 sps:$4 sm:$0xff]  }
 0x12d   :  { %2111 = vmatpush1.bf16.msra.mxu1 %v3600_v20  ;;  %v3739_v20 = vld [vmem:[#allocation10] sm:$0xff]  }
 0x12e   :  { %2197 = vmatpush1.bf16.msra.mxu0 %v3603_v21  ;;  %2112 = vmatprep.subr.bf16.mxu1 %v3608_v22  ;;  %v3740_v21 = vld [vmem:[#allocation10 + $0x48] sm:$0xff]  }
 0x12f   :  { %2198 = vmatprep.subr.bf16.mxu0 %v3611_v23  ;;  %v3787_v22 = vld [vmem:[#allocation4 + $0x8] ss:$24 sps:$4 sm:$0xff]  }
 0x130   :  { %v3693_v23 = vld [vmem:[#allocation7 + $0x640] ss:$24 sps:$4 sm:$0xff]  }
 0x131   :  { %2113 = vmatpush1.bf16.msra.mxu1 %v3606_v24  ;;  %v3788_v24 = vld [vmem:[#allocation4 + $0x14] ss:$24 sps:$4 sm:$0xff]  }
 0x132   :  { %2199 = vmatpush1.bf16.msra.mxu0 %v3609_v26  ;;  %2114 = vmatprep.subr.bf16.mxu1 %v3614_v27  ;;  %v3741_v26 = vld [vmem:[#allocation10 + $0x8] sm:$0xff]   ;;  %v3742_v27 = vld [vmem:[#allocation10 + $0x50] sm:$0xff]  }
 0x133   :  { %2200 = vmatprep.subr.bf16.mxu0 %v3617_v7  ;;  %v3696_v7 = vld [vmem:[#allocation7 + $0x670] ss:$24 sps:$4 sm:$0xff]  }
 0x135   :  { %2115 = vmatpush1.bf16.msra.mxu1 %v3612_v6  ;;  %v3701_v6 = vld [vmem:[#allocation7 + $0x6a4] ss:$24 sps:$4 sm:$0xff]  }
 0x136   :  { %2201 = vmatpush1.bf16.msra.mxu0 %v3615_v28  ;;  %2116 = vmatprep.subr.bf16.mxu1 %v3620_v49  ;;  %v3743_v28 = vld [vmem:[#allocation10 + $0x10] sm:$0xff]  }
 0x137   :  { %2202 = vmatprep.subr.bf16.mxu0 %v3623_v48  ;;  %v3699_v49 = vld [vmem:[#allocation7 + $0x6a0] ss:$24 sps:$4 sm:$0xff]   ;;  %v3704_v48 = vld [vmem:[#allocation7 + $0x6d4] ss:$24 sps:$4 sm:$0xff]  }
 0x139   :  { %2117 = vmatpush1.bf16.msra.mxu1 %v3618_v29  ;;  %v3745_v29 = vld [vmem:[#allocation10 + $0x18] sm:$0xff]  }
 0x13a   :  { %2203 = vmatpush1.bf16.msra.mxu0 %v3621_v30  ;;  %2118 = vmatprep.subr.bf16.mxu1 %v3626_v34  ;;  %v3746_v30 = vld [vmem:[#allocation10 + $0x60] sm:$0xff]  }
 0x13b   :  { %2204 = vmatprep.subr.bf16.mxu0 %v3629_v31  ;;  %v3702_v34 = vld [vmem:[#allocation7 + $0x6d0] ss:$24 sps:$4 sm:$0xff]   ;;  %v3707_v31 = vld [vmem:[#allocation7 + $0x704] ss:$24 sps:$4 sm:$0xff]  }
 0x13d   :  { %2119 = vmatpush1.bf16.msra.mxu1 %v3624_v32  ;;  %v3747_v32 = vld [vmem:[#allocation10 + $0x20] sm:$0xff]  }
 0x13e   :  { %2205 = vmatpush1.bf16.msra.mxu0 %v3627_v33  ;;  %2120 = vmatprep.subr.bf16.mxu1 %v3632_v35  ;;  %v3748_v33 = vld [vmem:[#allocation10 + $0x68] sm:$0xff]   ;;  %v3705_v35 = vld [vmem:[#allocation7 + $0x700] ss:$24 sps:$4 sm:$0xff]  }
 0x13f   :  { %2206 = vmatprep.subr.bf16.mxu0 %v3635_v36  ;;  %v3710_v36 = vld [vmem:[#allocation7 + $0x734] ss:$24 sps:$4 sm:$0xff]  }
 0x141   :  { %2121 = vmatpush1.bf16.msra.mxu1 %v3630_v37  ;;  %v3749_v37 = vld [vmem:[#allocation10 + $0x28] sm:$0xff]  }
 0x142   :  { %2207 = vmatpush1.bf16.msra.mxu0 %v3633_v38  ;;  %2122 = vmatprep.subr.bf16.mxu1 %v3638_v39  ;;  %v3750_v39 = vld [vmem:[#allocation10 + $0x70] sm:$0xff]  }
 0x143   :  { %2208 = vmatprep.subr.bf16.mxu0 %v3641_v40 }
 0x145   :  { %2123 = vmatpush1.bf16.msra.mxu1 %v3636_v41  ;;  %v3708_v41 = vld [vmem:[#allocation7 + $0x730] ss:$24 sps:$4 sm:$0xff]  }
 0x146   :  { %2209 = vmatpush1.bf16.msra.mxu0 %v3639_v42  ;;  %2124 = vmatprep.subr.bf16.mxu1 %v3644_v43  ;;  %v3713_v43 = vld [vmem:[#allocation7 + $0x764] ss:$24 sps:$4 sm:$0xff]  }
 0x147   :  { %2210 = vmatprep.subr.bf16.mxu0 %v3647_v44 }
 0x149   :  { %2125 = vmatpush1.bf16.msra.mxu1 %v3642_v45  ;;  %v3751_v45 = vld [vmem:[#allocation10 + $0x30] sm:$0xff]  }
 0x14a   :  { %2211 = vmatpush1.bf16.msra.mxu0 %v3645_v46  ;;  %2126 = vmatprep.subr.bf16.mxu1 %v3650_v47  ;;  %v3752_v46 = vld [vmem:[#allocation10 + $0x78] sm:$0xff]  }
 0x14b   :  { %2212 = vmatprep.subr.bf16.mxu0 %v3653_v50  ;;  %v3711_v47 = vld [vmem:[#allocation7 + $0x760] ss:$24 sps:$4 sm:$0xff]   ;;  %v3716_v50 = vld [vmem:[#allocation7 + $0x794] ss:$24 sps:$4 sm:$0xff]  }
 0x14d   :  { %2127 = vmatpush1.bf16.msra.mxu1 %v3648_v51  ;;  %v3753_v51 = vld [vmem:[#allocation10 + $0x38] sm:$0xff]  }
 0x14e   :  { %2213 = vmatpush1.bf16.msra.mxu0 %v3651_v52  ;;  %2128 = vmatprep.subr.bf16.mxu1 %v3656_v53  ;;  %v3754_v52 = vld [vmem:[#allocation10 + $0xc0] sm:$0xff]  }
 0x14f   :  { %2214 = vmatprep.subr.bf16.mxu0 %v3659_v54  ;;  %v3714_v53 = vld [vmem:[#allocation7 + $0x790] ss:$24 sps:$4 sm:$0xff]   ;;  %v3719_v54 = vld [vmem:[#allocation7 + $0x7c4] ss:$24 sps:$4 sm:$0xff]  }
 0x151   :  { %2129 = vmatpush1.bf16.msra.mxu1 %v3654_v55  ;;  %v3717_v55 = vld [vmem:[#allocation7 + $0x7c0] ss:$24 sps:$4 sm:$0xff]  }
 0x152   :  { %2215 = vmatpush1.bf16.msra.mxu0 %v3657_v56  ;;  %2130 = vmatprep.subr.bf16.mxu1 %v3662_v57  ;;  %v3722_v56 = vld [vmem:[#allocation7 + $0x7f4] ss:$24 sps:$4 sm:$0xff]   ;;  %v3720_v57 = vld [vmem:[#allocation7 + $0x7f0] ss:$24 sps:$4 sm:$0xff]  }
 0x153   :  { %2216 = vmatprep.subr.bf16.mxu0 %v3665_v58  ;;  %v3725_v58 = vld [vmem:[#allocation7 + $0x824] ss:$24 sps:$4 sm:$0xff]  }
 0x155   :  { %2131 = vmatpush1.bf16.msra.mxu1 %v3660_v59  ;;  %v3723_v59 = vld [vmem:[#allocation7 + $0x820] ss:$24 sps:$4 sm:$0xff]  }
 0x156   :  { %2217 = vmatpush1.bf16.msra.mxu0 %v3663_v60  ;;  %2132 = vmatprep.subr.bf16.mxu1 %v3668_v61  ;;  %v3728_v60 = vld [vmem:[#allocation7 + $0x854] ss:$24 sps:$4 sm:$0xff]   ;;  %v3726_v61 = vld [vmem:[#allocation7 + $0x850] ss:$24 sps:$4 sm:$0xff]  }
 0x157   :  { %2218 = vmatprep.subr.bf16.mxu0 %v3671_v62  ;;  %v3731_v62 = vld [vmem:[#allocation7 + $0x884] ss:$24 sps:$4 sm:$0xff]  }
 0x159   :  { %2133 = vmatpush1.bf16.msra.mxu1 %v3666_v63  ;;  %v3729_v63 = vld [vmem:[#allocation7 + $0x880] ss:$24 sps:$4 sm:$0xff]  }
 0x15a   :  { %2219 = vmatpush1.bf16.msra.mxu0 %v3669_v0  ;;  %2134 = vmatprep.subr.bf16.mxu1 %v3674_v1  ;;  %v3734_v0 = vld [vmem:[#allocation7 + $0x8b4] ss:$24 sps:$4 sm:$0xff]   ;;  %v3732_v1 = vld [vmem:[#allocation7 + $0x8b0] ss:$24 sps:$4 sm:$0xff]  }
 0x15b   :  { %2220 = vmatprep.subr.bf16.mxu0 %v3677_v2  ;;  %v3737_v2 = vld [vmem:[#allocation7 + $0x8e4] ss:$24 sps:$4 sm:$0xff]  }
 0x15d   :  { %2135 = vmatpush1.bf16.msra.mxu1 %v3672_v3  ;;  %v3735_v3 = vld [vmem:[#allocation7 + $0x8e0] ss:$24 sps:$4 sm:$0xff]  }
 0x15e   :  { %2221 = vmatpush1.bf16.msra.mxu0 %v3675_v4  ;;  %2136 = vmatprep.subr.bf16.mxu1 %v3680_v5  ;;  %v3789_v4 = vld [vmem:[#allocation4 + $0x10] ss:$24 sps:$4 sm:$0xff]   ;;  %v393_v5 = vlaneseq }
 0x15f   :  { %2222 = vmatprep.subr.bf16.mxu0 %v3683_v8 }
 0x160   :  { %v4084_v8 = vshrl.u32 %v393_v5, 7  ;;  %v3776_v5 = vld [vmem:[#allocation10 + $0x158] sm:$0xff]  }
 0x161   :  { %2137 = vmatpush1.bf16.msra.mxu1 %v3678_v9 }
 0x162   :  { %2223 = vmatpush1.bf16.msra.mxu0 %v3681_v10  ;;  %2138 = vmatprep.subr.bf16.mxu1 %v3686_v12  ;;  %v395_v9 = vsub.s32 0, %v4084_v8  ;;  %v4087_v10 = vld [vmem:[#allocation9] sm:$0x3f]  ;;  %v399_v12 = vsub.s32 1, %v4084_v8 }
 0x163   :  { %2224 = vmatprep.subr.bf16.mxu0 %v3689_v13 }
 0x164   :  { %v396_v13 = vrot.slane %v4087_v10, %v395_v9  ;;  %v3777_v9 = vld [vmem:[#allocation10 + $0x118] sm:$0xff]  }
 0x165   :  { %2139 = vmatpush1.bf16.msra.mxu1 %v3684_v14  ;;  %v400_v14 = vrot.slane %v4087_v10, %v399_v12  ;;  %v3778_v12 = vld [vmem:[#allocation10 + $0x160] sm:$0xff]  }
 0x166   :  { %2225 = vmatpush1.bf16.msra.mxu0 %v3687_v15  ;;  %3182 = vmatprep.subr.bf16.mxu1 %v3738_v17 }
 0x167   :  { %2237 = vmatprep.subr.bf16.mxu0 %v3692_v16 }
 0x168   :  { %2141 = vmatmul.mubr.bf16.vlgmr.msra.gmra.mrb[4].mxu1 %v4070_v11  ;;  %v3744_v11 = vld [vmem:[#allocation10 + $0x58] sm:$0xff]  }
 0x169   :  { %2227 = vmatmul.mubr.bf16.vlgmr.msra.gmra.mrb[4].mxu0 %v3787_v22  ;;  %3183 = vmatpush3.bf16.msra.mxu1 %v3739_v20 }
 0x16a   :  { %2238 = vmatpush1.bf16.msra.mxu0 %v3690_v18  ;;  %2269 = vmatprep.mubr.bf16.mxu0 %v3788_v24 }
 0x16b   :  { %2239 = vmatprep.subr.bf16.mxu0 %v3695_v19  ;;  %3184 = vmatprep.subr.bf16.mxu1 %v3740_v21 }
 0x16d   :  { %3185 = vmatpush3.bf16.msra.mxu1 %v3741_v26 }
 0x16e   :  { %2240 = vmatpush1.bf16.msra.mxu0 %v3693_v23  ;;  %3186 = vmatprep.subr.bf16.mxu1 %v3742_v27 }
 0x16f   :  { %2241 = vmatprep.subr.bf16.mxu0 %v3698_v25 }
 0x171   :  { %3187 = vmatpush3.bf16.msra.mxu1 %v3743_v28 }
 0x172   :  { %2242 = vmatpush1.bf16.msra.mxu0 %v3696_v7  ;;  %3188 = vmatprep.subr.bf16.mxu1 %v3744_v11 }
 0x173   :  { %2243 = vmatprep.subr.bf16.mxu0 %v3701_v6 }
 0x175   :  { %3189 = vmatpush3.bf16.msra.mxu1 %v3745_v29  ;;  %v3756_v29 = vld [vmem:[#allocation10 + $0xc8] sm:$0xff]  }
 0x176   :  { %2244 = vmatpush1.bf16.msra.mxu0 %v3699_v49  ;;  %3190 = vmatprep.subr.bf16.mxu1 %v3746_v30  ;;  %v3757_v30 = vld [vmem:[#allocation10 + $0x88] sm:$0xff]  }
 0x177   :  { %2245 = vmatprep.subr.bf16.mxu0 %v3704_v48  ;;  %v3755_v48 = vld [vmem:[#allocation10 + $0x80] sm:$0xff]  }
 0x179   :  { %3191 = vmatpush3.bf16.msra.mxu1 %v3747_v32  ;;  %v3760_v32 = vld [vmem:[#allocation10 + $0xd8] sm:$0xff]  }
 0x17a   :  { %2246 = vmatpush1.bf16.msra.mxu0 %v3702_v34  ;;  %3192 = vmatprep.subr.bf16.mxu1 %v3748_v33  ;;  %v3758_v34 = vld [vmem:[#allocation10 + $0xd0] sm:$0xff]   ;;  %v3761_v33 = vld [vmem:[#allocation10 + $0x98] sm:$0xff]  }
 0x17b   :  { %2247 = vmatprep.subr.bf16.mxu0 %v3707_v31  ;;  %v4080_v38 = vpop.f32.mrb[0].mxu1  ;;  %v3759_v31 = vld [vmem:[#allocation10 + $0x90] sm:$0xff]  }
 0x17c   :  { %v4082_v40 = vpop.f32.mrb[1].mxu1  ;;  %v1928_v15 = vadd.f32 %v4080_v38, %v396_v13  ;;  %v3765_v38 = vld [vmem:[#allocation10 + $0xa8] sm:$0xff]  }
 0x17d   :  { %v1931_v42 = vpop.f32.mrb[2].mxu1  ;;  %3193 = vmatpush3.bf16.msra.mxu1 %v3749_v37  ;;  %v1930_v16 = vadd.f32 %v4082_v40, %v400_v14  ;;  %v3764_v37 = vld [vmem:[#allocation10 + $0xe8] sm:$0xff]   ;;  %v3767_v40 = vld [vmem:[#allocation10 + $0xb0] sm:$0xff]  }
 0x17e   :  { %2248 = vmatpush1.bf16.msra.mxu0 %v3705_v35  ;;  %v1933_v44 = vpop.f32.mrb[3].mxu1  ;;  %3194 = vmatprep.subr.bf16.mxu1 %v3750_v39  ;;  %v1932_v18 = vadd.f32 %v1931_v42, %v396_v13  ;;  %v3762_v35 = vld [vmem:[#allocation10 + $0xe0] sm:$0xff]   ;;  %v3766_v39 = vld [vmem:[#allocation10 + $0xf0] sm:$0xff]   ;;  %v3769_v42 = vld [vmem:[#allocation10 + $0xb8] sm:$0xff]  }
 0x17f   :  { %2249 = vmatprep.subr.bf16.mxu0 %v3710_v36  ;;  %v1934_v21 = vadd.f32 %v1933_v44, %v400_v14  ;;  %v3763_v36 = vld [vmem:[#allocation10 + $0xa0] sm:$0xff]   ;;  %v403_v44 = vsub.s32 2, %v4084_v8  ;;  %v3780_v14 = vld [vmem:[#allocation10 + $0x168] sm:$0xff]  }
 0x180   :  { %v3779_v13 = vld [vmem:[#allocation10 + $0x120] sm:$0xff]  }
 0x181   :  { %3195 = vmatpush3.bf16.msra.mxu1 %v3751_v45  ;;  %v407_v45 = vsub.s32 3, %v4084_v8 }
 0x182   :  { %2250 = vmatpush1.bf16.msra.mxu0 %v3708_v41  ;;  %3196 = vmatprep.subr.bf16.mxu1 %v3752_v46  ;;  %v3768_v41 = vld [vmem:[#allocation10 + $0xf8] sm:$0xff]   ;;  %v404_v46 = vrot.slane %v4087_v10, %v403_v44 }
 0x183   :  { %2251 = vmatprep.subr.bf16.mxu0 %v3713_v43  ;;  %v3770_v43 = vld [vmem:[#allocation10 + $0x140] sm:$0xff]  }
 0x185   :  { %3197 = vmatpush3.bf16.msra.mxu1 %v3753_v51 }
 0x186   :  { %2252 = vmatpush1.bf16.msra.mxu0 %v3711_v47  ;;  %3204 = vmatprep.subr.bf16.mxu1 %v3754_v52  ;;  %v408_v47 = vrot.slane %v4087_v10, %v407_v45 }
 0x187   :  { %2253 = vmatprep.subr.bf16.mxu0 %v3716_v50 }
 0x18a   :  { %2254 = vmatpush1.bf16.msra.mxu0 %v3714_v53 }
 0x18b   :  { %2255 = vmatprep.subr.bf16.mxu0 %v3719_v54 }
 0x18e   :  { %2256 = vmatpush1.bf16.msra.mxu0 %v3717_v55 }
 0x18f   :  { %2257 = vmatprep.subr.bf16.mxu0 %v3722_v56 }
 0x192   :  { %2258 = vmatpush1.bf16.msra.mxu0 %v3720_v57 }
 0x193   :  { %2259 = vmatprep.subr.bf16.mxu0 %v3725_v58 }
 0x196   :  { %2260 = vmatpush1.bf16.msra.mxu0 %v3723_v59 }
 0x197   :  { %2261 = vmatprep.subr.bf16.mxu0 %v3728_v60 }
 0x19a   :  { %2262 = vmatpush1.bf16.msra.mxu0 %v3726_v61 }
 0x19b   :  { %2263 = vmatprep.subr.bf16.mxu0 %v3731_v62 }
 0x19e   :  { %2264 = vmatpush1.bf16.msra.mxu0 %v3729_v63 }
 0x19f   :  { %2265 = vmatprep.subr.bf16.mxu0 %v3734_v0  ;;  %v3771_v0 = vld [vmem:[#allocation10 + $0x100] sm:$0xff]  }
 0x1a2   :  { %2266 = vmatpush1.bf16.msra.mxu0 %v3732_v1  ;;  %v3772_v1 = vld [vmem:[#allocation10 + $0x148] sm:$0xff]  }
 0x1a3   :  { %2267 = vmatprep.subr.bf16.mxu0 %v3737_v2  ;;  %v3773_v2 = vld [vmem:[#allocation10 + $0x108] sm:$0xff]  }
 0x1a6   :  { %2268 = vmatpush1.bf16.msra.mxu0 %v3735_v3  ;;  %v3774_v3 = vld [vmem:[#allocation10 + $0x150] sm:$0xff]  }
 0x1a9   :  { %2270 = vmatmul.mubr.bf16.vlgmr.msra.gmra.mrb[4].mxu0 %v3789_v4  ;;  %v3775_v4 = vld [vmem:[#allocation10 + $0x110] sm:$0xff]  }
 0x1bc   :  { %v2013_v17 = vpop.f32.mrb[0].mxu0 }
 0x1bd   :  { %v3249_v19 = vadd.f32 %v2013_v17, %v1928_v15  ;;  %v2015_v20 = vpop.f32.mrb[1].mxu0  ;;  %v3781_v15 = vld [vmem:[#allocation10 + $0x128] sm:$0xff]   ;;  %v3783_v17 = vld [vmem:[#allocation10 + $0x130] sm:$0xff]  }
 0x1be   :  { %v3251_v22 = vadd.f32 %v2015_v20, %v1930_v16  ;;  %v2017_v23 = vpop.f32.mrb[2].mxu0  ;;  %v3782_v16 = vld [vmem:[#allocation10 + $0x170] sm:$0xff]   ;;  %v411_v20 = vsub.s32 4, %v4084_v8 }
 0x1bf   :  { %v3253_v24 = vadd.f32 %v2017_v23, %v1932_v18  ;;  %v2019_v25 = vpop.f32.mrb[3].mxu0  ;;  %v2280_v27 = vmax.f32 %v3249_v19, 0.0  ;;  %v3784_v18 = vld [vmem:[#allocation10 + $0x178] sm:$0xff]  }
 0x1c0   :  { %v3255_v26 = vadd.f32 %v2019_v25, %v1934_v21  ;;  %v2281_v6 = vmax.f32 %v3251_v22, 0.0  ;;  %v3785_v19 = vld [vmem:[#allocation10 + $0x138] sm:$0xff]   ;;  %v415_v21 = vsub.s32 5, %v4084_v8  ;;  %v412_v22 = vrot.slane %v4087_v10, %v411_v20 }
 0x1c1   :  { %v2286_v7 = vmax.f32 %v3253_v24, 0.0 }
 0x1c2   :  { %v2287_v28 = vmax.f32 %v3255_v26, 0.0  ;;  %v416_v23 = vrot.slane %v4087_v10, %v415_v21 }
 0x1c3   :  { %v2292_v11 = vpack.c.bf16 %v2286_v7, %v2280_v27 }
 0x1c4   :  { %v2293_v49 = vpack.c.bf16 %v2287_v28, %v2281_v6 }
 0x1c6   :  { %2721 = vmatprep.mubr.bf16.mxu1 %v2293_v49 }
 0x1c7   :  { %2722 = vmatmul.mubr.bf16.vlgmr.msra.gmra.mrb[8].mxu1 %v2292_v11 }
 0x1c8   :  { %3205 = vmatpush3.bf16.msra.mxu1 %v3755_v48 }
 0x1c9   :  { %3206 = vmatprep.subr.bf16.mxu1 %v3756_v29 }
 0x1cc   :  { %3207 = vmatpush3.bf16.msra.mxu1 %v3757_v30 }
 0x1cd   :  { %3208 = vmatprep.subr.bf16.mxu1 %v3758_v34 }
 0x1d0   :  { %3209 = vmatpush3.bf16.msra.mxu1 %v3759_v31 }
 0x1d1   :  { %3210 = vmatprep.subr.bf16.mxu1 %v3760_v32 }
 0x1d4   :  { %3211 = vmatpush3.bf16.msra.mxu1 %v3761_v33 }
 0x1d5   :  { %3212 = vmatprep.subr.bf16.mxu1 %v3762_v35 }
 0x1d8   :  { %3213 = vmatpush3.bf16.msra.mxu1 %v3763_v36 }
 0x1d9   :  { %3214 = vmatprep.subr.bf16.mxu1 %v3764_v37  ;;  %v3133_v37 = vld [vmem:[#allocation12] ss:$0 sm:$0xff] }
 0x1dc   :  { %3215 = vmatpush3.bf16.msra.mxu1 %v3765_v38 }
 0x1dd   :  { %3216 = vmatprep.subr.bf16.mxu1 %v3766_v39 }
 0x1e0   :  { %3217 = vmatpush3.bf16.msra.mxu1 %v3767_v40 }
 0x1e1   :  { %3218 = vmatprep.subr.bf16.mxu1 %v3768_v41 }
 0x1e4   :  { %3219 = vmatpush3.bf16.msra.mxu1 %v3769_v42 }
 0x1e5   :  { %3226 = vmatprep.subr.bf16.mxu1 %v3770_v43 }
 0x23b   :  { %v2142_v50 = vpop.f32.mrb[4].mxu1 }
 0x23c   :  { %v3256_v51 = vadd.f32 %v2142_v50, %v404_v46  ;;  %v2144_v52 = vpop.f32.mrb[5].mxu1 }
 0x23d   :  { %v3257_v53 = vadd.f32 %v2144_v52, %v408_v47  ;;  %v2146_v54 = vpop.f32.mrb[6].mxu1 }
 0x23e   :  { %v3258_v55 = vadd.f32 %v2146_v54, %v404_v46  ;;  %v2148_v56 = vpop.f32.mrb[7].mxu1  ;;  %v2282_v58 = vmax.f32 %v3256_v51, 0.0 }
 0x23f   :  { %v3259_v57 = vadd.f32 %v2148_v56, %v408_v47  ;;  %v2283_v60 = vmax.f32 %v3257_v53, 0.0 }
 0x240   :  { %v2288_v59 = vmax.f32 %v3258_v55, 0.0 }
 0x241   :  { %v2289_v61 = vmax.f32 %v3259_v57, 0.0 }
 0x242   :  { %v2294_v62 = vpack.c.bf16 %v2288_v59, %v2282_v58 }
 0x243   :  { %v2295_v63 = vpack.c.bf16 %v2289_v61, %v2283_v60 }
 0x245   :  { %2762 = vmatprep.mubr.bf16.mxu1 %v2295_v63 }
 0x246   :  { %2763 = vmatmul.mubr.bf16.vlgmr.msra.gmra.mrb[12].mxu1 %v2294_v62 }
 0x247   :  { %3227 = vmatpush3.bf16.msra.mxu1 %v3771_v0 }
 0x248   :  { %3228 = vmatprep.subr.bf16.mxu1 %v3772_v1 }
 0x24b   :  { %3229 = vmatpush3.bf16.msra.mxu1 %v3773_v2 }
 0x24c   :  { %3230 = vmatprep.subr.bf16.mxu1 %v3774_v3 }
 0x24f   :  { %3231 = vmatpush3.bf16.msra.mxu1 %v3775_v4 }
 0x250   :  { %3232 = vmatprep.subr.bf16.mxu1 %v3776_v5 }
 0x253   :  { %3233 = vmatpush3.bf16.msra.mxu1 %v3777_v9 }
 0x254   :  { %3234 = vmatprep.subr.bf16.mxu1 %v3778_v12 }
 0x257   :  { %3235 = vmatpush3.bf16.msra.mxu1 %v3779_v13 }
 0x258   :  { %3236 = vmatprep.subr.bf16.mxu1 %v3780_v14 }
 0x25b   :  { %3237 = vmatpush3.bf16.msra.mxu1 %v3781_v15 }
 0x25c   :  { %3238 = vmatprep.subr.bf16.mxu1 %v3782_v16 }
 0x25f   :  { %3239 = vmatpush3.bf16.msra.mxu1 %v3783_v17 }
 0x260   :  { %3240 = vmatprep.subr.bf16.mxu1 %v3784_v18 }
 0x263   :  { %3241 = vmatpush3.bf16.msra.mxu1 %v3785_v19 }
 0x27c   :  { %v2271_v24 = vpop.f32.mrb[4].mxu0 }
 0x27d   :  { %v3260_v25 = vadd.f32 %v2271_v24, %v412_v22  ;;  %v2273_v26 = vpop.f32.mrb[5].mxu0 }
 0x27e   :  { %v3261_v27 = vadd.f32 %v2273_v26, %v416_v23  ;;  %v2275_v7 = vpop.f32.mrb[6].mxu0 }
 0x27f   :  { %v3262_v6 = vadd.f32 %v2275_v7, %v412_v22  ;;  %v2277_v28 = vpop.f32.mrb[7].mxu0  ;;  %v2284_v49 = vmax.f32 %v3260_v25, 0.0 }
 0x280   :  { %v3263_v11 = vadd.f32 %v2277_v28, %v416_v23  ;;  %v2285_v29 = vmax.f32 %v3261_v27, 0.0 }
 0x281   :  { %v2290_v48 = vmax.f32 %v3262_v6, 0.0 }
 0x282   :  { %v2291_v30 = vmax.f32 %v3263_v11, 0.0 }
 0x283   :  { %v2296_v34 = vpack.c.bf16 %v2290_v48, %v2284_v49 }
 0x284   :  { %v2297_v31 = vpack.c.bf16 %v2291_v30, %v2285_v29 }
 0x286   :  { %2803 = vmatprep.mubr.bf16.mxu1 %v2297_v31 }
 0x287   :  { %2804 = vmatmul.mubr.bf16.vlgmr.msra.gmra.mrb[16].mxu1 %v2296_v34 }
 0x29a   :  { %v3198_v8 = vpop.f32.mrb[8].mxu1 }
 0x29b   :  { %v3199_v32 = vpop.f32.mrb[9].mxu1 }
 0x29c   :  { %v3200_v33 = vadd.f32 %v3199_v32, %v3198_v8  ;;  %v3201_v10 = vpop.f32.mrb[10].mxu1 }
 0x29d   :  { %v3202_v35 = vpop.f32.mrb[11].mxu1 }
 0x29e   :  { %v3203_v36 = vadd.f32 %v3202_v35, %v3201_v10  ;;  %v2724_v40 = vadd.f32 %v3200_v33, %v3133_v37 }
 0x2a0   :  { %v2727_v44 = vadd.f32 %v3203_v36, %v3133_v37 }
 0x319   :  { %v3220_v38 = vpop.f32.mrb[12].mxu1 }
 0x31a   :  { %v3221_v39 = vpop.f32.mrb[13].mxu1 }
 0x31b   :  { %v3222_v41 = vadd.f32 %v3221_v39, %v3220_v38  ;;  %v3223_v42 = vpop.f32.mrb[14].mxu1 }
 0x31c   :  { %v3224_v43 = vpop.f32.mrb[15].mxu1 }
 0x31d   :  { %v2765_v45 = vadd.f32 %v3222_v41, %v2724_v40  ;;  %v3225_v46 = vadd.f32 %v3224_v43, %v3223_v42 }
 0x31f   :  { %v2768_v47 = vadd.f32 %v3225_v46, %v2727_v44 }
 0x35a   :  { %v3242_v50 = vpop.f32.mrb[16].mxu1 }
 0x35b   :  { %v3243_v51 = vpop.f32.mrb[17].mxu1 }
 0x35c   :  { %v3244_v52 = vadd.f32 %v3243_v51, %v3242_v50  ;;  %v3245_v53 = vpop.f32.mrb[18].mxu1 }
 0x35d   :  { %v3246_v54 = vpop.f32.mrb[19].mxu1 }
 0x35e   :  { %v2806_v55 = vadd.f32 %v3244_v52, %v2765_v45  ;;  %v3247_v56 = vadd.f32 %v3246_v54, %v3245_v53 }
 0x360   :  { %2812 = vst [vmem:[#allocation13] sm:$0xff] %v2806_v55  ;;  %v2809_v57 = vadd.f32 %v3247_v56, %v2768_v47 }
 0x362   :  { %2813 = vst [vmem:[#allocation13 + $0x8] sm:$0xff] %v2809_v57 }
 0x363   :  { %3915 = shalt.err (!%p3912_p10)
}
 0x364   :  { %s3916_s19 = scalar_lea.hbm %s4120_s6, 256 }
 0x365   :  { %p3917_p11 = scmp.ne.s32.totalorder %s4120_s6, %s3916_s19  ;;  %p3920_p12 = scmp.lt.u32.totalorder %s3916_s19, %s4120_s6 }
 0x367   :  { %p3922_p13 = pnand %p3920_p12, %p3917_p11 }
 0x369   :  { %3925 = shalt.err (!%p3922_p13)
}
 0x36a   :  { %s3944_s24 = smov 128   ;;  %s3945_s2 = smov 8  }
 0x36b   :  { %2825 = dma.vmem_to_hbm [thread:$0]  %s2820_s30, 256, %s4120_s6, [#allocation6], %s3944_s24, %s3944_s24, %s3945_s2  }
 0x36c   :  { %3932 = dma.done.wait [#allocation6], 256  }
 0x36d   :  { %3933 = vsyncadd [#allocation6], 4294967040 }
 0x36e   :  { %2829 = vsyncpa [#allocation5], 1 }
 0x36f   :  { %2830 = vsyncpa [#allocation8], 1 }
 0x370   :  { %2831 = vsyncpa [#allocation11], 1 }
 0x371   :  { %2832 = vsyncpa [#allocation6], 1 }

</bundles_post_ra>
